<compile_context>
chip_gen: v5e
topology: v5e:2x2
jax: 0.10.0
libtpu: 0.0.40
codegen_flags: <defaults>
</compile_context>

<pallas_src>
import functools
import math

import jax
import jax.numpy as jnp
from jax.experimental import pallas as pl
from jax.experimental.pallas import tpu as pltpu

NEG_SLOPE = 0.01   # nn.LeakyReLU default negative_slope
BN_EPS = 1e-5      # nn.BatchNorm1d default eps


def _bn_scale_shift(gamma, beta, rmean, rvar):
    scale = gamma / jnp.sqrt(rvar + BN_EPS)
    shift = beta - rmean * scale
    return scale, shift


def _leaky_relu(x):
    return jnp.where(x >= 0, x, NEG_SLOPE * x)


# ----------------------------- in-kernel stages ------------------------------
def _conv_block(h, w_ref, b_ref, s_ref, sh_ref, ksize, dilation):
    """Dilated Conv1d (valid) + LeakyReLU + BatchNorm1d, channels-first.

    h: (Cin, T) f32; w_ref: (Cout, K*Cin) bf16 (im2col layout, tap-major);
    b_ref / s_ref / sh_ref: (Cout, 1) f32.
    """
    t_out = h.shape[1] - (ksize - 1) * dilation
    # im2col: stack the K dilated time-slices along the contraction axis and
    # do a single MXU pass (instead of K narrow tap matmuls).
    taps = [h[:, k * dilation:k * dilation + t_out] for k in range(ksize)]
    unfolded = jnp.concatenate(taps, axis=0).astype(jnp.bfloat16)   # (K*Cin, t_out)
    acc = jnp.dot(w_ref[...], unfolded,
                  preferred_element_type=jnp.float32)               # (Cout, t_out)
    acc = acc + b_ref[...]
    acc = _leaky_relu(acc)
    return acc * s_ref[...] + sh_ref[...]                           # BN (inference)


def _mha_block(h, wqkv_ref, bqkv_ref, wo_ref, bo_ref, s_ref, sh_ref, n_heads):
    """MultiheadAttention output + LeakyReLU + residual + BatchNorm1d, (C, T)."""
    c, t = h.shape
    d_head = c // n_heads
    h_bf = h.astype(jnp.bfloat16)
    # Fused QKV projection: one (3C, C) x (C, T) matmul.
    qkv = jnp.dot(wqkv_ref[...], h_bf,
                  preferred_element_type=jnp.float32) + bqkv_ref[...]   # (3C, T)
    q = qkv[0 * c:1 * c] * (1.0 / math.sqrt(d_head))    # sublane-aligned slices
    k = qkv[1 * c:2 * c]
    v = qkv[2 * c:3 * c]
    # Heads on the sublane axis: (C, T) -> (H, d_head, T) -> (H, T, d_head).
    q_t = jnp.transpose(q.reshape(n_heads, d_head, t), (0, 2, 1)).astype(jnp.bfloat16)
    k_t = jnp.transpose(k.reshape(n_heads, d_head, t), (0, 2, 1)).astype(jnp.bfloat16)
    v_t = jnp.transpose(v.reshape(n_heads, d_head, t), (0, 2, 1)).astype(jnp.bfloat16)
    # Head-batched attention (no per-head Python loop / concatenate).
    s = jnp.einsum('hqd,hkd->hqk', q_t, k_t,
                   preferred_element_type=jnp.float32)              # (H, T, T)
    s = s - jnp.max(s, axis=-1, keepdims=True)
    e = jnp.exp(s)
    p = e * pl.reciprocal(jnp.sum(e, axis=-1, keepdims=True), approx=True)
    # TODO(synk): flash-style K/V tiling + online softmax for long T (v7x VMEM).
    ctx = jnp.einsum('hqk,hkd->hqd', p.astype(jnp.bfloat16), v_t,
                     preferred_element_type=jnp.float32)            # (H, T, d_head)
    ctx = jnp.transpose(ctx, (0, 2, 1)).reshape(c, t)               # back to (C, T)
    attn = jnp.dot(wo_ref[...], ctx.astype(jnp.bfloat16),
                   preferred_element_type=jnp.float32) + bo_ref[...]
    attn = _leaky_relu(attn)            # activation(x_attention)
    y = h + attn                        # residual add
    return y * s_ref[...] + sh_ref[...]  # self.bn (inference)


def _pool_fc(y, w1_ref, b1_ref, s1_ref, t1_ref, w2_ref, b2_ref, s2_ref, t2_ref):
    """StatisticsPooling (mean ++ unbiased std over time) + fc1 + fc2."""
    t = y.shape[1]
    mean = jnp.mean(y, axis=1, keepdims=True)                       # (C, 1)
    centered = y - mean
    var = jnp.sum(centered * centered, axis=1, keepdims=True) / (t - 1)  # torch .std (T>1)
    std = jnp.sqrt(var)
    pooled = jnp.transpose(jnp.concatenate([mean, std], axis=0))    # (1, 2C)
    h = jnp.einsum('bi,oi->bo', pooled.astype(jnp.bfloat16), w1_ref[...],
                   preferred_element_type=jnp.float32) + b1_ref[...]
    h = _leaky_relu(h) * s1_ref[...] + t1_ref[...]
    h2 = jnp.einsum('bi,oi->bo', h.astype(jnp.bfloat16), w2_ref[...],
                    preferred_element_type=jnp.float32) + b2_ref[...]
    h2 = _leaky_relu(h2) * s2_ref[...] + t2_ref[...]
    return h2                                                       # (1, n_embed)


def xattention_kernel(*refs, conv_meta, n_heads):
    """One grid step = one utterance: conv blocks -> MHA -> pool -> fc1 -> fc2."""
    x_ref = refs[0]            # (1, n_mels, T)
    out_ref = refs[-1]         # (1, 1, n_embed)
    idx = 1
    h = x_ref[0].astype(jnp.float32)                       # (n_mels, T), channels-first
    for ksize, dilation in conv_meta:
        w_ref, b_ref, s_ref, sh_ref = refs[idx:idx + 4]
        idx += 4
        h = _conv_block(h, w_ref, b_ref, s_ref, sh_ref, ksize, dilation)
    wqkv_ref, bqkv_ref, wo_ref, bo_ref, sa_ref, sha_ref = refs[idx:idx + 6]
    idx += 6
    h = _mha_block(h, wqkv_ref, bqkv_ref, wo_ref, bo_ref, sa_ref, sha_ref, n_heads)
    out = _pool_fc(h, *refs[idx:idx + 8])
    out_ref[0] = out.astype(out_ref.dtype)


# --------------------------------- wrapper ------------------------------------
def _full_spec(arr):
    """Resident full-array VMEM block (constant block index across the grid)."""
    ndim = arr.ndim

    def idx(b):
        return (0,) * ndim

    return pl.BlockSpec(arr.shape, idx)


def xattention_forward(x, params):
    # x: (B, T, n_mels), like the PyTorch module's input; the reference does
    # x.transpose(1, 2) before Conv1d -> present the kernel the NCL layout.
    x_cf = jnp.swapaxes(x, 1, 2)                       # (B, n_mels, T)
    B, n_mels, T = x_cf.shape
    n_embed = params['n_embed']

    conv_meta = tuple((blk['ksize'], blk['dilation']) for blk in params['blocks'])
    weights = []
    for blk in params['blocks']:
        weights += [blk['w'], blk['b'], blk['scale'], blk['shift']]
    a = params['attn']
    weights += [a['wqkv'], a['bqkv'], a['wo'], a['bo'], a['scale'], a['shift']]
    f = params['fc']
    weights += [f['w1'], f['b1'], f['s1'], f['t1'],
                f['w2'], f['b2'], f['s2'], f['t2']]

    kernel = functools.partial(xattention_kernel,
                               conv_meta=conv_meta, n_heads=params['n_heads'])

    in_specs = [pl.BlockSpec((1, n_mels, T), lambda b: (b, 0, 0))]
    in_specs += [_full_spec(w) for w in weights]

    out = pl.pallas_call(
        kernel,
        out_shape=jax.ShapeDtypeStruct((B, 1, n_embed), jnp.float32),
        grid=(B,),
        in_specs=in_specs,
        out_specs=pl.BlockSpec((1, 1, n_embed), lambda b: (b, 0, 0)),
        compiler_params=pltpu.CompilerParams(
            dimension_semantics=("parallel",),        # megacore over the batch
            vmem_limit_bytes=32 * 1024 * 1024,        # re-derive for long T on v7x
        ),
    )(x_cf, *weights)
    return out[:, 0, :]                                # (B, n_embed)


# ------------------------------ parameter setup --------------------------------
def init_params(key, n_mels, cnn_channels, cnn_kernel, cnn_dilation,
                n_heads, n_embed):
    params = {'blocks': []}
    c_in = n_mels
    c_out = c_in
    for c_out, ks, dil in zip(cnn_channels, cnn_kernel, cnn_dilation):
        key, k1, k2, k3, k4, k5, k6 = jax.random.split(key, 7)
        w = 0.2 * jax.random.normal(k1, (c_out, ks, c_in), jnp.float32)
        b = 0.1 * jax.random.normal(k2, (c_out, 1), jnp.float32)
        gamma = 1.0 + 0.1 * jax.random.normal(k3, (c_out,), jnp.float32)
        beta = 0.05 * jax.random.normal(k4, (c_out,), jnp.float32)
        rmean = 0.02 * jax.random.normal(k5, (c_out,), jnp.float32)
        rvar = 1.0 + 0.2 * jax.random.uniform(k6, (c_out,), jnp.float32)
        scale, shift = _bn_scale_shift(gamma, beta, rmean, rvar)
        params['blocks'].append(dict(
            w=w.reshape(c_out, ks * c_in).astype(jnp.bfloat16),   # im2col layout
            b=b,
            scale=scale.reshape(c_out, 1),
            shift=shift.reshape(c_out, 1),
            ksize=ks, dilation=dil))
        c_in = c_out

    C = c_out
    key, kw, kb, ko, kob, kg, kbt, krm, krv = jax.random.split(key, 9)
    wqkv = 0.2 * jax.random.normal(kw, (3 * C, C), jnp.float32)     # [Wq; Wk; Wv]
    bqkv = 0.1 * jax.random.normal(kb, (3 * C,), jnp.float32)
    gamma = 1.0 + 0.1 * jax.random.normal(kg, (C,), jnp.float32)
    beta = 0.05 * jax.random.normal(kbt, (C,), jnp.float32)
    rmean = 0.02 * jax.random.normal(krm, (C,), jnp.float32)
    rvar = 1.0 + 0.2 * jax.random.uniform(krv, (C,), jnp.float32)
    scale, shift = _bn_scale_shift(gamma, beta, rmean, rvar)
    params['attn'] = dict(
        wqkv=wqkv.astype(jnp.bfloat16),
        bqkv=bqkv.reshape(3 * C, 1),
        wo=(0.2 * jax.random.normal(ko, (C, C), jnp.float32)).astype(jnp.bfloat16),
        bo=(0.1 * jax.random.normal(kob, (C,), jnp.float32)).reshape(C, 1),
        scale=scale.reshape(C, 1), shift=shift.reshape(C, 1))

    def fc_params(key, d_in, d_out):
        k1, k2, k3, k4, k5, k6 = jax.random.split(key, 6)
        w = (0.2 * jax.random.normal(k1, (d_out, d_in), jnp.float32)).astype(jnp.bfloat16)
        b = 0.1 * jax.random.normal(k2, (1, d_out), jnp.float32)
        gamma = 1.0 + 0.1 * jax.random.normal(k3, (d_out,), jnp.float32)
        beta = 0.05 * jax.random.normal(k4, (d_out,), jnp.float32)
        rmean = 0.02 * jax.random.normal(k5, (d_out,), jnp.float32)
        rvar = 1.0 + 0.2 * jax.random.uniform(k6, (d_out,), jnp.float32)
        s, t = _bn_scale_shift(gamma, beta, rmean, rvar)
        return w, b, s.reshape(1, d_out), t.reshape(1, d_out)

    key, kf1, kf2 = jax.random.split(key, 3)
    w1, b1, s1, t1 = fc_params(kf1, 2 * C, n_embed)
    w2, b2, s2, t2 = fc_params(kf2, n_embed, n_embed)
    params['fc'] = dict(w1=w1, b1=b1, s1=s1, t1=t1, w2=w2, b2=b2, s2=s2, t2=t2)
    params['n_heads'] = n_heads
    params['n_embed'] = n_embed
    return params


if __name__ == "__main__":
    # small, deterministic configuration consistent with the module
    n_mels = 8
    cnn_channels = [16, 32]
    cnn_kernel = [3, 3]
    cnn_dilation = [1, 2]
    n_heads = 4
    n_embed = 32
    B, T = 2, 16

    key = jax.random.PRNGKey(0)
    key, kx, kp = jax.random.split(key, 3)
    x = jax.random.normal(kx, (B, T, n_mels), jnp.float32)
    params = init_params(kp, n_mels, cnn_channels, cnn_kernel, cnn_dilation,
                         n_heads, n_embed)

    out = xattention_forward(x, params)
    out = jax.block_until_ready(out)
    assert out.shape == (B, n_embed), out.shape
    assert bool(jnp.all(jnp.isfinite(out)))
    print("KERNEL_OK")
</pallas_src>

<mosaic_0001>
module attributes {stable_mosaic.version = 11 : i64} {
  func.func @xattention_kernel(%arg0: i32, %arg1: memref<1x8x16xf32, #tpu.memory_space<vmem>>, %arg2: memref<16x24xbf16, #tpu.memory_space<vmem>>, %arg3: memref<16x1xf32, #tpu.memory_space<vmem>>, %arg4: memref<16x1xf32, #tpu.memory_space<vmem>>, %arg5: memref<16x1xf32, #tpu.memory_space<vmem>>, %arg6: memref<32x48xbf16, #tpu.memory_space<vmem>>, %arg7: memref<32x1xf32, #tpu.memory_space<vmem>>, %arg8: memref<32x1xf32, #tpu.memory_space<vmem>>, %arg9: memref<32x1xf32, #tpu.memory_space<vmem>>, %arg10: memref<96x32xbf16, #tpu.memory_space<vmem>>, %arg11: memref<96x1xf32, #tpu.memory_space<vmem>>, %arg12: memref<32x32xbf16, #tpu.memory_space<vmem>>, %arg13: memref<32x1xf32, #tpu.memory_space<vmem>>, %arg14: memref<32x1xf32, #tpu.memory_space<vmem>>, %arg15: memref<32x1xf32, #tpu.memory_space<vmem>>, %arg16: memref<32x64xbf16, #tpu.memory_space<vmem>>, %arg17: memref<1x32xf32, #tpu.memory_space<vmem>>, %arg18: memref<1x32xf32, #tpu.memory_space<vmem>>, %arg19: memref<1x32xf32, #tpu.memory_space<vmem>>, %arg20: memref<32x32xbf16, #tpu.memory_space<vmem>>, %arg21: memref<1x32xf32, #tpu.memory_space<vmem>>, %arg22: memref<1x32xf32, #tpu.memory_space<vmem>>, %arg23: memref<1x32xf32, #tpu.memory_space<vmem>>, %arg24: memref<1x1x32xf32, #tpu.memory_space<vmem>>) attributes {dimension_semantics = [#tpu.dimension_semantics<parallel>], iteration_bounds = array<i64: 2>, scalar_prefetch = 0 : i64, scratch_operands = 0 : i64, tpu.core_type = #tpu.core_type<tc>, window_params = [{transform_indices = @transform_0, window_bounds = array<i64: 1, 8, 16>}, {pipeline_mode = #tpu.pipeline_mode<synchronous>, transform_indices = @transform_1, window_bounds = array<i64: 16, 24>}, {pipeline_mode = #tpu.pipeline_mode<synchronous>, transform_indices = @transform_2, window_bounds = array<i64: 16, 1>}, {pipeline_mode = #tpu.pipeline_mode<synchronous>, transform_indices = @transform_3, window_bounds = array<i64: 16, 1>}, {pipeline_mode = #tpu.pipeline_mode<synchronous>, transform_indices = @transform_4, window_bounds = array<i64: 16, 1>}, {pipeline_mode = #tpu.pipeline_mode<synchronous>, transform_indices = @transform_5, window_bounds = array<i64: 32, 48>}, {pipeline_mode = #tpu.pipeline_mode<synchronous>, transform_indices = @transform_6, window_bounds = array<i64: 32, 1>}, {pipeline_mode = #tpu.pipeline_mode<synchronous>, transform_indices = @transform_7, window_bounds = array<i64: 32, 1>}, {pipeline_mode = #tpu.pipeline_mode<synchronous>, transform_indices = @transform_8, window_bounds = array<i64: 32, 1>}, {pipeline_mode = #tpu.pipeline_mode<synchronous>, transform_indices = @transform_9, window_bounds = array<i64: 96, 32>}, {pipeline_mode = #tpu.pipeline_mode<synchronous>, transform_indices = @transform_10, window_bounds = array<i64: 96, 1>}, {pipeline_mode = #tpu.pipeline_mode<synchronous>, transform_indices = @transform_11, window_bounds = array<i64: 32, 32>}, {pipeline_mode = #tpu.pipeline_mode<synchronous>, transform_indices = @transform_12, window_bounds = array<i64: 32, 1>}, {pipeline_mode = #tpu.pipeline_mode<synchronous>, transform_indices = @transform_13, window_bounds = array<i64: 32, 1>}, {pipeline_mode = #tpu.pipeline_mode<synchronous>, transform_indices = @transform_14, window_bounds = array<i64: 32, 1>}, {pipeline_mode = #tpu.pipeline_mode<synchronous>, transform_indices = @transform_15, window_bounds = array<i64: 32, 64>}, {pipeline_mode = #tpu.pipeline_mode<synchronous>, transform_indices = @transform_16, window_bounds = array<i64: 1, 32>}, {pipeline_mode = #tpu.pipeline_mode<synchronous>, transform_indices = @transform_17, window_bounds = array<i64: 1, 32>}, {pipeline_mode = #tpu.pipeline_mode<synchronous>, transform_indices = @transform_18, window_bounds = array<i64: 1, 32>}, {pipeline_mode = #tpu.pipeline_mode<synchronous>, transform_indices = @transform_19, window_bounds = array<i64: 32, 32>}, {pipeline_mode = #tpu.pipeline_mode<synchronous>, transform_indices = @transform_20, window_bounds = array<i64: 1, 32>}, {pipeline_mode = #tpu.pipeline_mode<synchronous>, transform_indices = @transform_21, window_bounds = array<i64: 1, 32>}, {pipeline_mode = #tpu.pipeline_mode<synchronous>, transform_indices = @transform_22, window_bounds = array<i64: 1, 32>}, {transform_indices = @transform_23, window_bounds = array<i64: 1, 1, 32>}]} {
    %c0 = arith.constant 0 : index
    %c0_0 = arith.constant 0 : index
    %c0_1 = arith.constant 0 : index
    %0 = vector.load %arg1[%c0, %c0_0, %c0_1] : memref<1x8x16xf32, #tpu.memory_space<vmem>>, vector<1x8x16xf32>
    %1 = vector.shape_cast %0 : vector<1x8x16xf32> to vector<8x16xf32>
    %2 = vector.extract_strided_slice %1 {offsets = [0, 0], sizes = [8, 14], strides = [1, 1]} : vector<8x16xf32> to vector<8x14xf32>
    %3 = vector.extract_strided_slice %1 {offsets = [0, 1], sizes = [8, 14], strides = [1, 1]} : vector<8x16xf32> to vector<8x14xf32>
    %4 = vector.extract_strided_slice %1 {offsets = [0, 2], sizes = [8, 14], strides = [1, 1]} : vector<8x16xf32> to vector<8x14xf32>
    %5 = tpu.concatenate %2, %3, %4 in 0 : vector<8x14xf32>, vector<8x14xf32>, vector<8x14xf32> -> vector<24x14xf32>
    %6 = arith.truncf %5 : vector<24x14xf32> to vector<24x14xbf16>
    %c0_2 = arith.constant 0 : index
    %c0_3 = arith.constant 0 : index
    %7 = vector.load %arg2[%c0_2, %c0_3] : memref<16x24xbf16, #tpu.memory_space<vmem>>, vector<16x24xbf16>
    %cst = arith.constant dense<0.000000e+00> : vector<16x14xf32>
    %8 = tpu.matmul %7, %6, %cst {dimension_numbers = #tpu.dot_dimension_numbers<[1], [0], [0], [1], [0, 0, 1, 1], [], []>} : vector<16x24xbf16>, vector<24x14xbf16>, vector<16x14xf32> -> vector<16x14xf32>
    %c0_4 = arith.constant 0 : index
    %c0_5 = arith.constant 0 : index
    %9 = vector.load %arg3[%c0_4, %c0_5] : memref<16x1xf32, #tpu.memory_space<vmem>>, vector<16x1xf32>
    %10 = vector.broadcast %9 : vector<16x1xf32> to vector<16x14xf32>
    %11 = arith.addf %8, %10 : vector<16x14xf32>
    %cst_6 = arith.constant 0.000000e+00 : f32
    %12 = vector.broadcast %cst_6 : f32 to vector<16x14xf32>
    %13 = arith.cmpf oge, %11, %12 : vector<16x14xf32>
    %cst_7 = arith.constant 0.00999999977 : f32
    %14 = vector.broadcast %cst_7 : f32 to vector<16x14xf32>
    %15 = arith.mulf %14, %11 : vector<16x14xf32>
    %16 = arith.select %13, %11, %15 : vector<16x14xi1>, vector<16x14xf32>
    %c0_8 = arith.constant 0 : index
    %c0_9 = arith.constant 0 : index
    %17 = vector.load %arg4[%c0_8, %c0_9] : memref<16x1xf32, #tpu.memory_space<vmem>>, vector<16x1xf32>
    %18 = vector.broadcast %17 : vector<16x1xf32> to vector<16x14xf32>
    %19 = arith.mulf %16, %18 : vector<16x14xf32>
    %c0_10 = arith.constant 0 : index
    %c0_11 = arith.constant 0 : index
    %20 = vector.load %arg5[%c0_10, %c0_11] : memref<16x1xf32, #tpu.memory_space<vmem>>, vector<16x1xf32>
    %21 = vector.broadcast %20 : vector<16x1xf32> to vector<16x14xf32>
    %22 = arith.addf %19, %21 : vector<16x14xf32>
    %23 = vector.extract_strided_slice %22 {offsets = [0, 0], sizes = [16, 10], strides = [1, 1]} : vector<16x14xf32> to vector<16x10xf32>
    %24 = vector.extract_strided_slice %22 {offsets = [0, 2], sizes = [16, 10], strides = [1, 1]} : vector<16x14xf32> to vector<16x10xf32>
    %25 = vector.extract_strided_slice %22 {offsets = [0, 4], sizes = [16, 10], strides = [1, 1]} : vector<16x14xf32> to vector<16x10xf32>
    %26 = tpu.concatenate %23, %24, %25 in 0 : vector<16x10xf32>, vector<16x10xf32>, vector<16x10xf32> -> vector<48x10xf32>
    %27 = arith.truncf %26 : vector<48x10xf32> to vector<48x10xbf16>
    %c0_12 = arith.constant 0 : index
    %c0_13 = arith.constant 0 : index
    %28 = vector.load %arg6[%c0_12, %c0_13] : memref<32x48xbf16, #tpu.memory_space<vmem>>, vector<32x48xbf16>
    %cst_14 = arith.constant dense<0.000000e+00> : vector<32x10xf32>
    %29 = tpu.matmul %28, %27, %cst_14 {dimension_numbers = #tpu.dot_dimension_numbers<[1], [0], [0], [1], [0, 0, 1, 1], [], []>} : vector<32x48xbf16>, vector<48x10xbf16>, vector<32x10xf32> -> vector<32x10xf32>
    %c0_15 = arith.constant 0 : index
    %c0_16 = arith.constant 0 : index
    %30 = vector.load %arg7[%c0_15, %c0_16] : memref<32x1xf32, #tpu.memory_space<vmem>>, vector<32x1xf32>
    %31 = vector.broadcast %30 : vector<32x1xf32> to vector<32x10xf32>
    %32 = arith.addf %29, %31 : vector<32x10xf32>
    %cst_17 = arith.constant 0.000000e+00 : f32
    %33 = vector.broadcast %cst_17 : f32 to vector<32x10xf32>
    %34 = arith.cmpf oge, %32, %33 : vector<32x10xf32>
    %cst_18 = arith.constant 0.00999999977 : f32
    %35 = vector.broadcast %cst_18 : f32 to vector<32x10xf32>
    %36 = arith.mulf %35, %32 : vector<32x10xf32>
    %37 = arith.select %34, %32, %36 : vector<32x10xi1>, vector<32x10xf32>
    %c0_19 = arith.constant 0 : index
    %c0_20 = arith.constant 0 : index
    %38 = vector.load %arg8[%c0_19, %c0_20] : memref<32x1xf32, #tpu.memory_space<vmem>>, vector<32x1xf32>
    %39 = vector.broadcast %38 : vector<32x1xf32> to vector<32x10xf32>
    %40 = arith.mulf %37, %39 : vector<32x10xf32>
    %c0_21 = arith.constant 0 : index
    %c0_22 = arith.constant 0 : index
    %41 = vector.load %arg9[%c0_21, %c0_22] : memref<32x1xf32, #tpu.memory_space<vmem>>, vector<32x1xf32>
    %42 = vector.broadcast %41 : vector<32x1xf32> to vector<32x10xf32>
    %43 = arith.addf %40, %42 : vector<32x10xf32>
    %44 = arith.truncf %43 : vector<32x10xf32> to vector<32x10xbf16>
    %c0_23 = arith.constant 0 : index
    %c0_24 = arith.constant 0 : index
    %45 = vector.load %arg10[%c0_23, %c0_24] : memref<96x32xbf16, #tpu.memory_space<vmem>>, vector<96x32xbf16>
    %cst_25 = arith.constant dense<0.000000e+00> : vector<96x10xf32>
    %46 = tpu.matmul %45, %44, %cst_25 {dimension_numbers = #tpu.dot_dimension_numbers<[1], [0], [0], [1], [0, 0, 1, 1], [], []>} : vector<96x32xbf16>, vector<32x10xbf16>, vector<96x10xf32> -> vector<96x10xf32>
    %c0_26 = arith.constant 0 : index
    %c0_27 = arith.constant 0 : index
    %47 = vector.load %arg11[%c0_26, %c0_27] : memref<96x1xf32, #tpu.memory_space<vmem>>, vector<96x1xf32>
    %48 = vector.broadcast %47 : vector<96x1xf32> to vector<96x10xf32>
    %49 = arith.addf %46, %48 : vector<96x10xf32>
    %50 = vector.extract_strided_slice %49 {offsets = [0, 0], sizes = [32, 10], strides = [1, 1]} : vector<96x10xf32> to vector<32x10xf32>
    %cst_28 = arith.constant 0.353553385 : f32
    %51 = vector.broadcast %cst_28 : f32 to vector<32x10xf32>
    %52 = arith.mulf %50, %51 : vector<32x10xf32>
    %53 = vector.extract_strided_slice %49 {offsets = [32, 0], sizes = [32, 10], strides = [1, 1]} : vector<96x10xf32> to vector<32x10xf32>
    %54 = vector.extract_strided_slice %49 {offsets = [64, 0], sizes = [32, 10], strides = [1, 1]} : vector<96x10xf32> to vector<32x10xf32>
    %55 = vector.shape_cast %52 : vector<32x10xf32> to vector<4x8x10xf32>
    %56 = tpu.transpose %55, [0, 2, 1] : vector<4x8x10xf32> -> vector<4x10x8xf32>
    %57 = arith.truncf %56 : vector<4x10x8xf32> to vector<4x10x8xbf16>
    %58 = vector.shape_cast %53 : vector<32x10xf32> to vector<4x8x10xf32>
    %59 = tpu.transpose %58, [0, 2, 1] : vector<4x8x10xf32> -> vector<4x10x8xf32>
    %60 = arith.truncf %59 : vector<4x10x8xf32> to vector<4x10x8xbf16>
    %61 = vector.shape_cast %54 : vector<32x10xf32> to vector<4x8x10xf32>
    %62 = tpu.transpose %61, [0, 2, 1] : vector<4x8x10xf32> -> vector<4x10x8xf32>
    %63 = arith.truncf %62 : vector<4x10x8xf32> to vector<4x10x8xbf16>
    "tpu.trace_start"() <{level = 10 : i32, message = "hqd,hkd->hqk"}> : () -> ()
    %cst_29 = arith.constant dense<0.000000e+00> : vector<4x10x10xf32>
    %64 = tpu.matmul %57, %60, %cst_29 {dimension_numbers = #tpu.dot_dimension_numbers<[2], [2], [1], [1], [0, 0, 0, 1, 1, 1], [0], [0]>} : vector<4x10x8xbf16>, vector<4x10x8xbf16>, vector<4x10x10xf32> -> vector<4x10x10xf32>
    "tpu.trace_stop"() : () -> ()
    %cst_30 = arith.constant dense<0xFF800000> : vector<4x10xf32>
    %65 = vector.multi_reduction <maximumf>, %64, %cst_30 [2] : vector<4x10x10xf32> to vector<4x10xf32>
    %66 = vector.shape_cast %65 : vector<4x10xf32> to vector<4x10x1xf32>
    %67 = vector.broadcast %66 : vector<4x10x1xf32> to vector<4x10x10xf32>
    %68 = arith.subf %64, %67 : vector<4x10x10xf32>
    %69 = math.exp %68 : vector<4x10x10xf32>
    %cst_31 = arith.constant dense<0.000000e+00> : vector<4x10xf32>
    %70 = vector.multi_reduction <add>, %69, %cst_31 [2] : vector<4x10x10xf32> to vector<4x10xf32>
    %71 = vector.shape_cast %70 : vector<4x10xf32> to vector<4x10x1xf32>
    %72 = tpu.reciprocal %71 {approx = true} : vector<4x10x1xf32> -> vector<4x10x1xf32>
    %73 = vector.broadcast %72 : vector<4x10x1xf32> to vector<4x10x10xf32>
    %74 = arith.mulf %69, %73 : vector<4x10x10xf32>
    %75 = arith.truncf %74 : vector<4x10x10xf32> to vector<4x10x10xbf16>
    "tpu.trace_start"() <{level = 10 : i32, message = "hqk,hkd->hqd"}> : () -> ()
    %cst_32 = arith.constant dense<0.000000e+00> : vector<4x10x8xf32>
    %76 = tpu.matmul %75, %63, %cst_32 {dimension_numbers = #tpu.dot_dimension_numbers<[2], [1], [1], [2], [0, 0, 0, 1, 1, 2], [0], [0]>} : vector<4x10x10xbf16>, vector<4x10x8xbf16>, vector<4x10x8xf32> -> vector<4x10x8xf32>
    "tpu.trace_stop"() : () -> ()
    %77 = tpu.transpose %76, [0, 2, 1] : vector<4x10x8xf32> -> vector<4x8x10xf32>
    %78 = vector.shape_cast %77 : vector<4x8x10xf32> to vector<32x10xf32>
    %c0_33 = arith.constant 0 : index
    %c0_34 = arith.constant 0 : index
    %79 = vector.load %arg12[%c0_33, %c0_34] : memref<32x32xbf16, #tpu.memory_space<vmem>>, vector<32x32xbf16>
    %80 = arith.truncf %78 : vector<32x10xf32> to vector<32x10xbf16>
    %cst_35 = arith.constant dense<0.000000e+00> : vector<32x10xf32>
    %81 = tpu.matmul %79, %80, %cst_35 {dimension_numbers = #tpu.dot_dimension_numbers<[1], [0], [0], [1], [0, 0, 1, 1], [], []>} : vector<32x32xbf16>, vector<32x10xbf16>, vector<32x10xf32> -> vector<32x10xf32>
    %c0_36 = arith.constant 0 : index
    %c0_37 = arith.constant 0 : index
    %82 = vector.load %arg13[%c0_36, %c0_37] : memref<32x1xf32, #tpu.memory_space<vmem>>, vector<32x1xf32>
    %83 = vector.broadcast %82 : vector<32x1xf32> to vector<32x10xf32>
    %84 = arith.addf %81, %83 : vector<32x10xf32>
    %cst_38 = arith.constant 0.000000e+00 : f32
    %85 = vector.broadcast %cst_38 : f32 to vector<32x10xf32>
    %86 = arith.cmpf oge, %84, %85 : vector<32x10xf32>
    %cst_39 = arith.constant 0.00999999977 : f32
    %87 = vector.broadcast %cst_39 : f32 to vector<32x10xf32>
    %88 = arith.mulf %87, %84 : vector<32x10xf32>
    %89 = arith.select %86, %84, %88 : vector<32x10xi1>, vector<32x10xf32>
    %90 = arith.addf %43, %89 : vector<32x10xf32>
    %c0_40 = arith.constant 0 : index
    %c0_41 = arith.constant 0 : index
    %91 = vector.load %arg14[%c0_40, %c0_41] : memref<32x1xf32, #tpu.memory_space<vmem>>, vector<32x1xf32>
    %92 = vector.broadcast %91 : vector<32x1xf32> to vector<32x10xf32>
    %93 = arith.mulf %90, %92 : vector<32x10xf32>
    %c0_42 = arith.constant 0 : index
    %c0_43 = arith.constant 0 : index
    %94 = vector.load %arg15[%c0_42, %c0_43] : memref<32x1xf32, #tpu.memory_space<vmem>>, vector<32x1xf32>
    %95 = vector.broadcast %94 : vector<32x1xf32> to vector<32x10xf32>
    %96 = arith.addf %93, %95 : vector<32x10xf32>
    %cst_44 = arith.constant dense<0.000000e+00> : vector<32xf32>
    %97 = vector.multi_reduction <add>, %96, %cst_44 [1] : vector<32x10xf32> to vector<32xf32>
    %98 = vector.shape_cast %97 : vector<32xf32> to vector<32x1xf32>
    %cst_45 = arith.constant 1.000000e+01 : f32
    %99 = vector.broadcast %cst_45 : f32 to vector<32x1xf32>
    %100 = arith.divf %98, %99 : vector<32x1xf32>
    %101 = vector.broadcast %100 : vector<32x1xf32> to vector<32x10xf32>
    %102 = arith.subf %96, %101 : vector<32x10xf32>
    %103 = arith.mulf %102, %102 : vector<32x10xf32>
    %cst_46 = arith.constant dense<0.000000e+00> : vector<32xf32>
    %104 = vector.multi_reduction <add>, %103, %cst_46 [1] : vector<32x10xf32> to vector<32xf32>
    %105 = vector.shape_cast %104 : vector<32xf32> to vector<32x1xf32>
    %cst_47 = arith.constant 9.000000e+00 : f32
    %106 = vector.broadcast %cst_47 : f32 to vector<32x1xf32>
    %107 = arith.divf %105, %106 : vector<32x1xf32>
    %108 = math.sqrt %107 : vector<32x1xf32>
    %109 = tpu.concatenate %100, %108 in 0 : vector<32x1xf32>, vector<32x1xf32> -> vector<64x1xf32>
    %110 = tpu.transpose %109, [1, 0] : vector<64x1xf32> -> vector<1x64xf32>
    %111 = arith.truncf %110 : vector<1x64xf32> to vector<1x64xbf16>
    %c0_48 = arith.constant 0 : index
    %c0_49 = arith.constant 0 : index
    %112 = vector.load %arg16[%c0_48, %c0_49] : memref<32x64xbf16, #tpu.memory_space<vmem>>, vector<32x64xbf16>
    "tpu.trace_start"() <{level = 10 : i32, message = "bi,oi->bo"}> : () -> ()
    %cst_50 = arith.constant dense<0.000000e+00> : vector<1x32xf32>
    %113 = tpu.matmul %111, %112, %cst_50 {dimension_numbers = #tpu.dot_dimension_numbers<[1], [1], [0], [0], [0, 0, 1, 0], [], []>} : vector<1x64xbf16>, vector<32x64xbf16>, vector<1x32xf32> -> vector<1x32xf32>
    "tpu.trace_stop"() : () -> ()
    %c0_51 = arith.constant 0 : index
    %c0_52 = arith.constant 0 : index
    %114 = vector.load %arg17[%c0_51, %c0_52] : memref<1x32xf32, #tpu.memory_space<vmem>>, vector<1x32xf32>
    %115 = arith.addf %113, %114 : vector<1x32xf32>
    %cst_53 = arith.constant 0.000000e+00 : f32
    %116 = vector.broadcast %cst_53 : f32 to vector<1x32xf32>
    %117 = arith.cmpf oge, %115, %116 : vector<1x32xf32>
    %cst_54 = arith.constant 0.00999999977 : f32
    %118 = vector.broadcast %cst_54 : f32 to vector<1x32xf32>
    %119 = arith.mulf %118, %115 : vector<1x32xf32>
    %120 = arith.select %117, %115, %119 : vector<1x32xi1>, vector<1x32xf32>
    %c0_55 = arith.constant 0 : index
    %c0_56 = arith.constant 0 : index
    %121 = vector.load %arg18[%c0_55, %c0_56] : memref<1x32xf32, #tpu.memory_space<vmem>>, vector<1x32xf32>
    %122 = arith.mulf %120, %121 : vector<1x32xf32>
    %c0_57 = arith.constant 0 : index
    %c0_58 = arith.constant 0 : index
    %123 = vector.load %arg19[%c0_57, %c0_58] : memref<1x32xf32, #tpu.memory_space<vmem>>, vector<1x32xf32>
    %124 = arith.addf %122, %123 : vector<1x32xf32>
    %125 = arith.truncf %124 : vector<1x32xf32> to vector<1x32xbf16>
    %c0_59 = arith.constant 0 : index
    %c0_60 = arith.constant 0 : index
    %126 = vector.load %arg20[%c0_59, %c0_60] : memref<32x32xbf16, #tpu.memory_space<vmem>>, vector<32x32xbf16>
    "tpu.trace_start"() <{level = 10 : i32, message = "bi,oi->bo"}> : () -> ()
    %cst_61 = arith.constant dense<0.000000e+00> : vector<1x32xf32>
    %127 = tpu.matmul %125, %126, %cst_61 {dimension_numbers = #tpu.dot_dimension_numbers<[1], [1], [0], [0], [0, 0, 1, 0], [], []>} : vector<1x32xbf16>, vector<32x32xbf16>, vector<1x32xf32> -> vector<1x32xf32>
    "tpu.trace_stop"() : () -> ()
    %c0_62 = arith.constant 0 : index
    %c0_63 = arith.constant 0 : index
    %128 = vector.load %arg21[%c0_62, %c0_63] : memref<1x32xf32, #tpu.memory_space<vmem>>, vector<1x32xf32>
    %129 = arith.addf %127, %128 : vector<1x32xf32>
    %cst_64 = arith.constant 0.000000e+00 : f32
    %130 = vector.broadcast %cst_64 : f32 to vector<1x32xf32>
    %131 = arith.cmpf oge, %129, %130 : vector<1x32xf32>
    %cst_65 = arith.constant 0.00999999977 : f32
    %132 = vector.broadcast %cst_65 : f32 to vector<1x32xf32>
    %133 = arith.mulf %132, %129 : vector<1x32xf32>
    %134 = arith.select %131, %129, %133 : vector<1x32xi1>, vector<1x32xf32>
    %c0_66 = arith.constant 0 : index
    %c0_67 = arith.constant 0 : index
    %135 = vector.load %arg22[%c0_66, %c0_67] : memref<1x32xf32, #tpu.memory_space<vmem>>, vector<1x32xf32>
    %136 = arith.mulf %134, %135 : vector<1x32xf32>
    %c0_68 = arith.constant 0 : index
    %c0_69 = arith.constant 0 : index
    %137 = vector.load %arg23[%c0_68, %c0_69] : memref<1x32xf32, #tpu.memory_space<vmem>>, vector<1x32xf32>
    %138 = arith.addf %136, %137 : vector<1x32xf32>
    %c0_70 = arith.constant 0 : index
    %c0_71 = arith.constant 0 : index
    %c0_72 = arith.constant 0 : index
    %139 = vector.load %arg24[%c0_70, %c0_71, %c0_72] : memref<1x1x32xf32, #tpu.memory_space<vmem>>, vector<1x1x32xf32>
    %140 = vector.shape_cast %139 : vector<1x1x32xf32> to vector<1x32xf32>
    %141 = vector.shape_cast %138 : vector<1x32xf32> to vector<1x1x32xf32>
    tpu.vector_store %arg24[%c0_70, %c0_71, %c0_72], %141 {strides = array<i32>} : memref<1x1x32xf32, #tpu.memory_space<vmem>>, vector<1x1x32xf32>,
    return
  }
  func.func @transform_0(%arg0: i32) -> (i32, i32, i32) {
    %c0_i32 = arith.constant 0 : i32
    %c0_i32_0 = arith.constant 0 : i32
    %c0_i32_1 = arith.constant 0 : i32
    return %arg0, %c0_i32, %c0_i32_0 : i32, i32, i32
  }
  func.func @transform_1(%arg0: i32) -> (i32, i32) {
    %c0_i32 = arith.constant 0 : i32
    %c0_i32_0 = arith.constant 0 : i32
    %c0_i32_1 = arith.constant 0 : i32
    return %c0_i32, %c0_i32_0 : i32, i32
  }
  func.func @transform_2(%arg0: i32) -> (i32, i32) {
    %c0_i32 = arith.constant 0 : i32
    %c0_i32_0 = arith.constant 0 : i32
    %c0_i32_1 = arith.constant 0 : i32
    return %c0_i32, %c0_i32_0 : i32, i32
  }
  func.func @transform_3(%arg0: i32) -> (i32, i32) {
    %c0_i32 = arith.constant 0 : i32
    %c0_i32_0 = arith.constant 0 : i32
    %c0_i32_1 = arith.constant 0 : i32
    return %c0_i32, %c0_i32_0 : i32, i32
  }
  func.func @transform_4(%arg0: i32) -> (i32, i32) {
    %c0_i32 = arith.constant 0 : i32
    %c0_i32_0 = arith.constant 0 : i32
    %c0_i32_1 = arith.constant 0 : i32
    return %c0_i32, %c0_i32_0 : i32, i32
  }
  func.func @transform_5(%arg0: i32) -> (i32, i32) {
    %c0_i32 = arith.constant 0 : i32
    %c0_i32_0 = arith.constant 0 : i32
    %c0_i32_1 = arith.constant 0 : i32
    return %c0_i32, %c0_i32_0 : i32, i32
  }
  func.func @transform_6(%arg0: i32) -> (i32, i32) {
    %c0_i32 = arith.constant 0 : i32
    %c0_i32_0 = arith.constant 0 : i32
    %c0_i32_1 = arith.constant 0 : i32
    return %c0_i32, %c0_i32_0 : i32, i32
  }
  func.func @transform_7(%arg0: i32) -> (i32, i32) {
    %c0_i32 = arith.constant 0 : i32
    %c0_i32_0 = arith.constant 0 : i32
    %c0_i32_1 = arith.constant 0 : i32
    return %c0_i32, %c0_i32_0 : i32, i32
  }
  func.func @transform_8(%arg0: i32) -> (i32, i32) {
    %c0_i32 = arith.constant 0 : i32
    %c0_i32_0 = arith.constant 0 : i32
    %c0_i32_1 = arith.constant 0 : i32
    return %c0_i32, %c0_i32_0 : i32, i32
  }
  func.func @transform_9(%arg0: i32) -> (i32, i32) {
    %c0_i32 = arith.constant 0 : i32
    %c0_i32_0 = arith.constant 0 : i32
    %c0_i32_1 = arith.constant 0 : i32
    return %c0_i32, %c0_i32_0 : i32, i32
  }
  func.func @transform_10(%arg0: i32) -> (i32, i32) {
    %c0_i32 = arith.constant 0 : i32
    %c0_i32_0 = arith.constant 0 : i32
    %c0_i32_1 = arith.constant 0 : i32
    return %c0_i32, %c0_i32_0 : i32, i32
  }
  func.func @transform_11(%arg0: i32) -> (i32, i32) {
    %c0_i32 = arith.constant 0 : i32
    %c0_i32_0 = arith.constant 0 : i32
    %c0_i32_1 = arith.constant 0 : i32
    return %c0_i32, %c0_i32_0 : i32, i32
  }
  func.func @transform_12(%arg0: i32) -> (i32, i32) {
    %c0_i32 = arith.constant 0 : i32
    %c0_i32_0 = arith.constant 0 : i32
    %c0_i32_1 = arith.constant 0 : i32
    return %c0_i32, %c0_i32_0 : i32, i32
  }
  func.func @transform_13(%arg0: i32) -> (i32, i32) {
    %c0_i32 = arith.constant 0 : i32
    %c0_i32_0 = arith.constant 0 : i32
    %c0_i32_1 = arith.constant 0 : i32
    return %c0_i32, %c0_i32_0 : i32, i32
  }
  func.func @transform_14(%arg0: i32) -> (i32, i32) {
    %c0_i32 = arith.constant 0 : i32
    %c0_i32_0 = arith.constant 0 : i32
    %c0_i32_1 = arith.constant 0 : i32
    return %c0_i32, %c0_i32_0 : i32, i32
  }
  func.func @transform_15(%arg0: i32) -> (i32, i32) {
    %c0_i32 = arith.constant 0 : i32
    %c0_i32_0 = arith.constant 0 : i32
    %c0_i32_1 = arith.constant 0 : i32
    return %c0_i32, %c0_i32_0 : i32, i32
  }
  func.func @transform_16(%arg0: i32) -> (i32, i32) {
    %c0_i32 = arith.constant 0 : i32
    %c0_i32_0 = arith.constant 0 : i32
    %c0_i32_1 = arith.constant 0 : i32
    return %c0_i32, %c0_i32_0 : i32, i32
  }
  func.func @transform_17(%arg0: i32) -> (i32, i32) {
    %c0_i32 = arith.constant 0 : i32
    %c0_i32_0 = arith.constant 0 : i32
    %c0_i32_1 = arith.constant 0 : i32
    return %c0_i32, %c0_i32_0 : i32, i32
  }
  func.func @transform_18(%arg0: i32) -> (i32, i32) {
    %c0_i32 = arith.constant 0 : i32
    %c0_i32_0 = arith.constant 0 : i32
    %c0_i32_1 = arith.constant 0 : i32
    return %c0_i32, %c0_i32_0 : i32, i32
  }
  func.func @transform_19(%arg0: i32) -> (i32, i32) {
    %c0_i32 = arith.constant 0 : i32
    %c0_i32_0 = arith.constant 0 : i32
    %c0_i32_1 = arith.constant 0 : i32
    return %c0_i32, %c0_i32_0 : i32, i32
  }
  func.func @transform_20(%arg0: i32) -> (i32, i32) {
    %c0_i32 = arith.constant 0 : i32
    %c0_i32_0 = arith.constant 0 : i32
    %c0_i32_1 = arith.constant 0 : i32
    return %c0_i32, %c0_i32_0 : i32, i32
  }
  func.func @transform_21(%arg0: i32) -> (i32, i32) {
    %c0_i32 = arith.constant 0 : i32
    %c0_i32_0 = arith.constant 0 : i32
    %c0_i32_1 = arith.constant 0 : i32
    return %c0_i32, %c0_i32_0 : i32, i32
  }
  func.func @transform_22(%arg0: i32) -> (i32, i32) {
    %c0_i32 = arith.constant 0 : i32
    %c0_i32_0 = arith.constant 0 : i32
    %c0_i32_1 = arith.constant 0 : i32
    return %c0_i32, %c0_i32_0 : i32, i32
  }
  func.func @transform_23(%arg0: i32) -> (i32, i32, i32) {
    %c0_i32 = arith.constant 0 : i32
    %c0_i32_0 = arith.constant 0 : i32
    %c0_i32_1 = arith.constant 0 : i32
    return %arg0, %c0_i32, %c0_i32_0 : i32, i32, i32
  }
}

</mosaic_0001>

<bundles_post_ra>
// kernel: tpu_custom_call.1
= control target key start
LH: loop header
LB: loop body
LE: loop exit
PB: predicated region body
PF: predicated region fallthrough
CT: control target
= control target key end

     0   :  { %s3286_s0 = inlined_call_operand.vmem [shape: f32[2,8,16], index: 0, kind: input, shape index: {}]   ;;  %s3287_s1 = inlined_call_operand.vmem [shape: bf16[16,24], index: 1, kind: input, shape index: {}]   ;;  %s3288_s2 = inlined_call_operand.vmem [shape: f32[16,1], index: 2, kind: input, shape index: {}]   ;;  %s3289_s3 = inlined_call_operand.vmem [shape: f32[16,1], index: 3, kind: input, shape index: {}]   ;;  %s3290_s4 = inlined_call_operand.vmem [shape: f32[16,1], index: 4, kind: input, shape index: {}]   ;;  %s3291_s5 = inlined_call_operand.vmem [shape: bf16[32,48], index: 5, kind: input, shape index: {}]   ;;  %s3292_s6 = inlined_call_operand.vmem [shape: f32[32,1], index: 6, kind: input, shape index: {}]   ;;  %s3293_s7 = inlined_call_operand.vmem [shape: f32[32,1], index: 7, kind: input, shape index: {}]   ;;  %s3294_s8 = inlined_call_operand.vmem [shape: f32[32,1], index: 8, kind: input, shape index: {}]   ;;  %s3295_s9 = inlined_call_operand.vmem [shape: bf16[96,32], index: 9, kind: input, shape index: {}]   ;;  %s3296_s10 = inlined_call_operand.vmem [shape: f32[96,1], index: 10, kind: input, shape index: {}]   ;;  %s3297_s11 = inlined_call_operand.vmem [shape: bf16[32,32], index: 11, kind: input, shape index: {}]   ;;  %s3298_s12 = inlined_call_operand.vmem [shape: f32[32,1], index: 12, kind: input, shape index: {}]   ;;  %s3299_s13 = inlined_call_operand.vmem [shape: f32[32,1], index: 13, kind: input, shape index: {}]   ;;  %s3300_s14 = inlined_call_operand.vmem [shape: f32[32,1], index: 14, kind: input, shape index: {}]   ;;  %s3301_s15 = inlined_call_operand.vmem [shape: bf16[32,64], index: 15, kind: input, shape index: {}]   ;;  %s3302_s16 = inlined_call_operand.vmem [shape: f32[1,32], index: 16, kind: input, shape index: {}]   ;;  %s3303_s17 = inlined_call_operand.vmem [shape: f32[1,32], index: 17, kind: input, shape index: {}]   ;;  %s3304_s18 = inlined_call_operand.vmem [shape: f32[1,32], index: 18, kind: input, shape index: {}]   ;;  %s3305_s19 = inlined_call_operand.vmem [shape: bf16[32,32], index: 19, kind: input, shape index: {}]   ;;  %s3306_s20 = inlined_call_operand.vmem [shape: f32[1,32], index: 20, kind: input, shape index: {}]   ;;  %s3307_s21 = inlined_call_operand.vmem [shape: f32[1,32], index: 21, kind: input, shape index: {}]   ;;  %s3308_s22 = inlined_call_operand.vmem [shape: f32[1,32], index: 22, kind: input, shape index: {}]   ;;  %s3309_s23 = inlined_call_operand.hbm [shape: f32[2,1,32], index: 23, kind: output, shape index: {}]  }
   0x1   :  { %3329 = sst [smem:[#allocation12_spill]] %s3286_s0 }
   0x2   :  { %3330 = sst [smem:[#allocation13_spill]] %s3287_s1 }
   0x3   :  { %3331 = sst [smem:[#allocation14_spill]] %s3288_s2 }
   0x4   :  { %3332 = sst [smem:[#allocation15_spill]] %s3289_s3 }
   0x5   :  { %3333 = sst [smem:[#allocation16_spill]] %s3290_s4 }
   0x6   :  { %3334 = sst [smem:[#allocation17_spill]] %s3291_s5 }
   0x7   :  { %3335 = sst [smem:[#allocation18_spill]] %s3292_s6 }
   0x8   :  { %3336 = sst [smem:[#allocation19_spill]] %s3293_s7 }
   0x9   :  { %3337 = sst [smem:[#allocation20_spill]] %s3294_s8 }
   0xa   :  { %3338 = sst [smem:[#allocation21_spill]] %s3307_s21 }
   0xb   :  { %3339 = sst [smem:[#allocation22_spill]] %s3308_s22 }
   0xc   :  { %3340 = sst [smem:[#allocation23_spill]] %s3309_s23 }
   0xd   :  { %28 = vsyncpa [#allocation3], 0 }
   0xe   :  { %30 = vsyncpa [#allocation3 + $0x1], 0  ;;  %s2900_s4 = smov 0   ;;  %s2902_s30 = smov 0  }
   0xf   :  { %s2904_s24 = smov 0   ;;  %s2906_s25 = smov 0  }
  0x10 LB: > { %3341 = sst [smem:[#allocation5_spill]] %s2760_s4  ;;  %s2921_s5 = sadd.s32 4294967295, %s2772_s25   ;;  %s2772_s25 = sphi %s2906_s25, %s3367_s25   ;;  %s2768_s24 = sphi %s2904_s24, %s3369_s24   ;;  %s2764_s30 = sphi %s2902_s30, %s3371_s30   ;;  %s2760_s4 = sphi %s2900_s4, %s3370_s4  }
  0x11   : > { %3342 = sst [smem:[#allocation6_spill]] %s2768_s24  ;;  %s2426_s1 = sadd.s32 4294967294, %s2772_s25  }
  0x12   : > { %3343 = sst [smem:[#allocation7_spill]] %s2772_s25  ;;  %s2925_s26 = sadd.s32 1, %s2772_s25  }
  0x13   : > { %3344 = sst [smem:[#allocation8_spill]] %s2925_s26  ;;  %s531_s2 = sadd.s32 1, %s2768_s24 }
  0x14   : > { %s528_s6 = ssub.s32 %s2772_s25, %s2925_s26  ;;  %p541_p0 = scmp.ne.s32.totalorder %s2768_s24, %s2764_s30 }
  0x15   : > { %p529_p1 = scmp.eq.s32.totalorder %s528_s6, 0  ;;  %p542_p2 = scmp.eq.s32.totalorder %s2921_s5, 1 }
  0x16   : > { %p547_p3 = scmp.ne.s32.totalorder %s2764_s30, %s2760_s4  ;;  %p548_p4 = scmp.eq.s32.totalorder %s2426_s1, 1 }
  0x17   : > { %s2936_s27 = scalar_select %p529_p1, %s2768_s24, %s531_s2  }
  0x18   : > { %p2938_p5 = por %p542_p2, %p541_p0  ;;  %p2942_p6 = por %p548_p4, %p547_p3 }
  0x19   : > { %3345 = sst [smem:[#allocation9_spill]] %s2936_s27  ;;  %p2429_p7 = scmp.ge.s32.totalorder %s2772_s25, 1 }
  0x1a   : > { %s3346_s7 = scalar_select %p2938_p5, 1, 0 }
  0x1b   : > { %s3348_s28 = scalar_select %p2942_p6, 1, 0 }
  0x1c   : > { %3347 = sst [smem:[#allocation10_spill]] %s3346_s7  ;;  %p639_p8 = scmp.lt.s32.totalorder %s2772_s25, 3 }
  0x1d   : > { %3349 = sst [smem:[#allocation11_spill]] %s3348_s28 }
  0x1e   : > { %p640_p9 = pnand %p2429_p7, %p639_p8 }
  0x1f   : > { %p701_p10 = scmp.lt.s32.totalorder (!%p640_p9), %s2921_s5, 1  ;;  %s3350_s2 = sld [smem:[#allocation12_spill]] (!%p640_p9) }
  0x20   : > { %643 = sbr.rel (%p640_p9) target bundleno = 2682 (0xa7a), region = 112  ;;  %s2775_s27 = smov (!%p640_p9), 126  }
  0x21   : > { %s2776_s24 = smov (!%p640_p9), 127   ;;  %s3351_s4 = sld [smem:[#allocation16_spill]] (!%p640_p9) }
  0x22   : > { %s3353_s21 = sld [smem:[#allocation18_spill]] (!%p640_p9)  ;;  %s699_s22 = sand.u32 (!%p640_p9), 1, %s2764_s30  }
  0x23   : > { %s3354_s0 = sld [smem:[#allocation19_spill]] (!%p640_p9)  ;;  %s700_s26 = scalar_lea.vmem (!%p640_p9), [#allocation2], %s699_s22 }
  0x24   : > { %s3356_s8 = sld [smem:[#allocation20_spill]] (!%p640_p9) }
  0x25   : > { %v2774_v0 = vmov 0   ;;  %s702_s29 = scalar_select %p701_p10, %s2921_s5, 1  ;;  %v954_v11 = vld [vmem:[%s3296_s10] sm:$0xff]  ;;  %v960_v13 = vld [vmem:[%s3296_s10 + $0x30] sm:$0xff]  ;;  %vm739_vm0 = vcmask 1043456   ;;  %v957_v17 = vld [vmem:[%s3296_s10 + $0x18] sm:$0xff] }
  0x26   : > { %2577 = vset.pattern.permute.xlu0 %v2774_v0  ;;  %2575 = vset.pattern.permute.xlu1 %v2774_v0  ;;  %vm735_vm1 = vcmask 195584   ;;  %v959_v49 = vld [vmem:[%s3296_s10 + $0x28] sm:$0xff]  ;;  %v958_v50 = vld [vmem:[%s3296_s10 + $0x20] sm:$0xff]  ;;  %v961_v51 = vld [vmem:[%s3296_s10 + $0x38] sm:$0xff]  ;;  %vm846_vm4 = vcmask 392192   ;;  %vm1056_vm9 = vcmask 261120  }
  0x27   : > { %2576 = vset.pattern.permute.xlu2 %v2774_v0  ;;  %s2430_s3 = sshll.u32 %s702_s29, 3  ;;  %s3352_s7 = smov %s3351_s4  ;;  %v777_v2 = vld [vmem:[%s3351_s4] sm:$0xff]  ;;  %v955_v52 = vld [vmem:[%s3296_s10 + $0x8] sm:$0xff]  ;;  %v956_v53 = vld [vmem:[%s3296_s10 + $0x10] sm:$0xff]  ;;  %vm1536_vm10 = vcmask 64512   ;;  %vm1647_vm11 = vcmask 80896  }
  0x28   : > { %s704_s6 = scalar_lea.vmem %s3350_s2, %s2430_s3  ;;  %v815_v3 = vld [vmem:[%s3353_s21 + $0x18] sm:$0xff]  ;;  %s3355_s2 = sld [smem:[#allocation14_spill]]  ;;  %v778_v10 = vld [vmem:[%s3352_s7 + $0x8] sm:$0xff]  ;;  %v812_v41 = vld [vmem:[%s3353_s21] sm:$0xff]  ;;  %vm1651_vm12 = vcmask 74752   ;;  %vm1758_vm13 = vcmask 1044480  }
  0x29   : > { %v706_v1 = vld [vmem:[%s704_s6] sm:$0xff]  ;;  %v886_v4 = vld [vmem:[%s3354_s0 + $0x10] sm:$0xff]  ;;  %s3357_s29 = sld [smem:[#allocation15_spill]]  ;;  %s2777_s6 = smov 124   ;;  %v887_v43 = vld [vmem:[%s3354_s0 + $0x18] sm:$0xff] }
  0x2a   : > { %711 = vrot.lane.b32.xlu0 %v706_v1, %s2775_s27  ;;  %v915_v6 = vld [vmem:[%s3356_s8 + $0x18] sm:$0xff]  ;;  %v912_v8 = vld [vmem:[%s3356_s8] sm:$0xff]  ;;  %v814_v42 = vld [vmem:[%s3353_s21 + $0x10] sm:$0xff]  ;;  %s3359_s3 = sld [smem:[#allocation17_spill]]  ;;  %s2369_s7 = sshll.u32 %s700_s26, 4  ;;  %s2370_s7 = int_to_ptr.vmem [resolvable:$true] %s2369_s7 }
  0x2b   : > { %v813_v44 = vld [vmem:[%s3353_s21 + $0x8] sm:$0xff]  ;;  %v884_v45 = vld [vmem:[%s3354_s0] sm:$0xff]  ;;  %v914_v46 = vld [vmem:[%s3356_s8 + $0x10] sm:$0xff]  ;;  %s3360_s28 = sld [smem:[#allocation23_spill]] }
  0x2c   : > { %v913_v47 = vld [vmem:[%s3356_s8 + $0x8] sm:$0xff] }
  0x2d   : > { %v885_v48 = vld [vmem:[%s3354_s0 + $0x8] sm:$0xff] }
  0x2e   : > { %v718_v5 = vld [vmem:[%s3355_s2] sm:$0xff]  ;;  %v719_v7 = vld [vmem:[%s3355_s2 + $0x8] sm:$0xff] }
  0x2f   : > { %722 = vperm.xlu1 %2575, %v718_v5   ;;  %v763_v9 = vld [vmem:[%s3357_s29] sm:$0xff]  ;;  %v764_v12 = vld [vmem:[%s3357_s29 + $0x8] sm:$0xff] }
  0x30   : > { %767 = vperm.xlu2 %2576, %v763_v9   ;;  %v2515_v62 = vld [vmem:[%s3359_s3] sm:$0xff]  ;;  %v2516_v63 = vld [vmem:[%s3359_s3 + $0x8] sm:$0xff]  ;;  %s3362_s3 = sld [smem:[#allocation22_spill]] }
  0x31   : > { %s2367_s1 = scalar_lea.hbm %s3360_s28, %s2921_s5  ;;  %s2359_s5 = scalar_lea.sflag [#allocation3], %s699_s22 }
  0x32   : > { %708 = vrot.lane.b32.xlu0 %v706_v1, %s2776_s24  ;;  %s3358_s24 = sld [smem:[#allocation13_spill]]  ;;  %s2371_s8 = sshll.u32 %s2367_s1, 4  ;;  %s2372_s8 = int_to_ptr.hbm [resolvable:$true] %s2371_s8 }
  0x33   : > { %s2724_s25 = sshra.s32 %s2372_s8, 4  ;;  %s2725_s25 = int_to_ptr.hbm [resolvable:$true] %s2724_s25 }
  0x34   : > { %s2726_s23 = scalar_lea.hbm %s2725_s25, 1  ;;  %p2731_p0 = scmp.lt.s32.totalorder %s2725_s25, %s3360_s28 }
  0x35   : > { %p2727_p11 = scmp.ne.s32.totalorder %s2725_s25, %s2726_s23 }
  0x37   : > { %727 = vperm.xlu1 %2575, %v719_v7   ;;  %p2728_p12 = pnand %p2727_p11, %p2938_p5 }
  0x38   : > { %772 = vperm.xlu2 %2576, %v764_v12   ;;  %v2514_v20 = vld [vmem:[%s3358_s24] sm:$0xff] }
  0x39   : > { %p2729_p13 = pneg %p2728_p12 }
  0x3a   : > { %781 = vperm.xlu0 %2577, %v777_v2  }
  0x3f   : > { %786 = vperm.xlu1 %2575, %v778_v10  }
  0x42   : > { %833 = vperm.xlu0 %2577, %v815_v3  }
  0x4a   : > { %900 = vperm.xlu0 %2577, %v886_v4  }
  0x52   : > { %933 = vperm.xlu0 %2577, %v915_v6  }
  0x5a   : > { %918 = vperm.xlu0 %2577, %v912_v8  }
  0x62   : > { %968 = vperm.xlu0 %2577, %v954_v11  }
  0x6a   : > { %998 = vperm.xlu0 %2577, %v960_v13  }
  0x72   : > { %983 = vperm.xlu0 %2577, %v957_v17  }
  0x8a   : > { %v768_v24 = vpop.permute.xlu2 %767 }
  0x92   : > { %v773_v32 = vpop.permute.xlu2 %772 }
  0x9c   : > { %v712_v14 = vpop.permute.xlu0 %711 }
  0x9d   : > { %v715_v15 = vpack.c.bf16 %v712_v14, %v712_v14 }
  0x9f   : > { %v741_v16 = vsel %vm739_vm0, %v715_v15, 0 }
  0xa0   : > { %749 = vmatpush.bf16.msra.mxu0 %v741_v16 }
  0xa1   : > { %v723_v21 = vpop.permute.xlu1 %722 }
  0xa4   : > { %v709_v18 = vpop.permute.xlu0 %708 }
  0xa5   : > { %v714_v19 = vpack.c.bf16 %v709_v18, %v706_v1 }
  0xa7   : > { %750 = vmatpush.bf16.msra.mxu0 %v714_v19 }
  0xa9   : > { %v728_v25 = vpop.permute.xlu1 %727 }
  0xaa   : > { %2435 = vmatmul.msk.bf16.vlgmr.msra.gmra.mxu0 %vm735_vm1, %v2514_v20 }
  0xac   : > { %v782_v35 = vpop.permute.xlu0 %781 }
  0xb1   : > { %v787_v36 = vpop.permute.xlu1 %786 }
  0xb4   : > { %v834_v3 = vpop.permute.xlu0 %833 }
  0xbc   : > { %v901_v7 = vpop.permute.xlu0 %900 }
  0xc4   : > { %v934_v17 = vpop.permute.xlu0 %933 }
 0x127   : > { %v752_v22 = vpop.f32.mrf.mxu0 }
 0x128   : > { %v753_v23 = vadd.f32 %v752_v22, %v723_v21 }
 0x12a   : > { %v759_v26 = vmul.f32 0.01, %v753_v23  ;;  %vm757_vm2 = vcmp.ge.f32.partialorder %v753_v23, 0.0 }
 0x12c   : > { %v761_v28 = vsel %vm757_vm2, %v753_v23, %v759_v26 }
 0x12d   : > { %v775_v31 = vmul.f32 %v768_v24, %v761_v28 }
 0x12f   : > { %v754_v27 = vpop.f32.mrf.mxu0  ;;  %v789_v37 = vadd.f32 %v782_v35, %v775_v31  ;;  %v919_v35 = vpop.permute.xlu0 %918 }
 0x130   : > { %v755_v29 = vadd.f32 %v754_v27, %v728_v25 }
 0x132   : > { %vm758_vm3 = vcmp.ge.f32.partialorder %v755_v29, 0.0  ;;  %v760_v30 = vmul.f32 0.01, %v755_v29 }
 0x134   : > { %v762_v33 = vsel %vm758_vm3, %v755_v29, %v760_v30 }
 0x135   : > { %v776_v34 = vmul.f32 %v773_v32, %v762_v33 }
 0x137   : > { %v790_v38 = vadd.f32 %v787_v36, %v776_v34 }
 0x139   : > { %v2583_v39 = vpack.i.bf16 %v790_v38, %v789_v37  ;;  %v805_v40 = vpack.c.bf16 %v790_v38, %v789_v37  ;;  %v2517_v38 = vld [vmem:[%s3295_s9] sm:$0xff] }
 0x13b   : > { %2584 = vrot.lane.b32.xlu1 %v2583_v39, %s2775_s27  ;;  %2579 = vrot.lane.b32.xlu2 %v2583_v39, %s2777_s6  ;;  %v2518_v39 = vld [vmem:[%s3295_s9 + $0x8] sm:$0xff]  ;;  %s3361_s6 = sld [smem:[#allocation21_spill]] }
 0x143   : > { %818 = vperm.xlu1 %2575, %v812_v41   ;;  %828 = vperm.xlu2 %2576, %v814_v42   ;;  %v2520_v41 = vld [vmem:[%s3295_s9 + $0x18] sm:$0xff] }
 0x14b   : > { %905 = vperm.xlu1 %2575, %v887_v43   ;;  %823 = vperm.xlu2 %2576, %v813_v44   ;;  %v969_v44 = vpop.permute.xlu0 %968 }
 0x153   : > { %890 = vperm.xlu1 %2575, %v884_v45   ;;  %928 = vperm.xlu2 %2576, %v914_v46  }
 0x15b   : > { %923 = vperm.xlu1 %2575, %v913_v47   ;;  %895 = vperm.xlu2 %2576, %v885_v48  }
 0x163   : > { %993 = vperm.xlu1 %2575, %v959_v49   ;;  %988 = vperm.xlu2 %2576, %v958_v50  }
 0x16b   : > { %1003 = vperm.xlu1 %2575, %v961_v51   ;;  %973 = vperm.xlu2 %2576, %v955_v52   ;;  %v999_v52 = vpop.permute.xlu0 %998 }
 0x173   : > { %978 = vperm.xlu2 %2576, %v956_v53  }
 0x195   : > { %v2580_v54 = vpop.permute.xlu2 %2579 }
 0x196   : > { %v2582_v55 = vunpack.i.h.bf16 %v2580_v54  ;;  %v2581_v56 = vunpack.i.l.bf16 %v2580_v54 }
 0x198   : > { %v807_v57 = vpack.c.bf16 %v2582_v55, %v2581_v56  ;;  %v984_v56 = vpop.permute.xlu0 %983 }
 0x19a   : > { %858 = vmatpush.bf16.msra.mxu1 %v807_v57 }
 0x19d   : > { %v829_v0 = vpop.permute.xlu2 %828 }
 0x1a5   : > { %v824_v5 = vpop.permute.xlu2 %823 }
 0x1ad   : > { %v2585_v58 = vpop.permute.xlu1 %2584  ;;  %v929_v10 = vpop.permute.xlu2 %928 }
 0x1ae   : > { %v2587_v59 = vunpack.i.h.bf16 %v2585_v58  ;;  %v2586_v60 = vunpack.i.l.bf16 %v2585_v58 }
 0x1b0   : > { %v806_v61 = vpack.c.bf16 %v2587_v59, %v2586_v60 }
 0x1b2   : > { %859 = vmatpush.bf16.msra.mxu1 %v806_v61 }
 0x1b5   : > { %v819_v2 = vpop.permute.xlu1 %818  ;;  %v896_v24 = vpop.permute.xlu2 %895 }
 0x1b6   : > { %860 = vmatpush.bf16.msra.mxu1 %v805_v40  ;;  %v2519_v40 = vld [vmem:[%s3295_s9 + $0x10] sm:$0xff] }
 0x1b9   : > { %2444 = vmatmul.msk.bf16.vlgmr.msra.gmra.mxu1 %vm846_vm4, %v2515_v62  ;;  %v2521_v62 = vld [vmem:[%s3295_s9 + $0x20] sm:$0xff] }
 0x1bd   : > { %v906_v6 = vpop.permute.xlu1 %905  ;;  %v989_v42 = vpop.permute.xlu2 %988 }
 0x1c5   : > { %v891_v14 = vpop.permute.xlu1 %890  ;;  %v974_v46 = vpop.permute.xlu2 %973 }
 0x1c9   : > { %2445 = vmatmul.msk.bf16.gmra.mxu1 %vm846_vm4, %v2516_v63  ;;  %vm2281_vm4 = vcmask 523264  }
 0x1cd   : > { %v924_v32 = vpop.permute.xlu1 %923  ;;  %v979_v54 = vpop.permute.xlu2 %978 }
 0x236   : > { %v862_v1 = vpop.f32.mrf.mxu1 }
 0x237   : > { %v863_v12 = vadd.f32 %v862_v1, %v819_v2 }
 0x239   : > { %v876_v18 = vmul.f32 0.01, %v863_v12  ;;  %vm872_vm7 = vcmp.ge.f32.partialorder %v863_v12, 0.0 }
 0x23b   : > { %v880_v25 = vsel %vm872_vm7, %v863_v12, %v876_v18  ;;  %v964_v12 = vld [vmem:[%s3296_s10 + $0x50] sm:$0xff] }
 0x23c   : > { %v908_v31 = vmul.f32 %v891_v14, %v880_v25 }
 0x23e   : > { %v864_v4 = vpop.f32.mrf.mxu1  ;;  %v3050_v36 = vadd.f32 %v919_v35, %v908_v31 }
 0x23f   : > { %v865_v11 = vadd.f32 %v864_v4, %v824_v5  ;;  %v2522_v5 = vld [vmem:[%s3295_s9 + $0x28] sm:$0xff] }
 0x241   : > { %v877_v15 = vmul.f32 0.01, %v865_v11  ;;  %vm873_vm6 = vcmp.ge.f32.partialorder %v865_v11, 0.0 }
 0x243   : > { %v881_v21 = vsel %vm873_vm6, %v865_v11, %v877_v15 }
 0x244   : > { %v909_v28 = vmul.f32 %v896_v24, %v881_v21 }
 0x246   : > { %v867_v8 = vpop.f32.mrf.mxu1  ;;  %v3048_v34 = vadd.f32 %v924_v32, %v909_v28 }
 0x247   : > { %v868_v9 = vadd.f32 %v867_v8, %v829_v0  ;;  %v994_v0 = vpop.permute.xlu1 %993 }
 0x248   : > { %v940_v37 = vpack.c.bf16 %v3048_v34, %v3050_v36 }
 0x249   : > { %v878_v13 = vmul.f32 0.01, %v868_v9  ;;  %vm874_vm5 = vcmp.ge.f32.partialorder %v868_v9, 0.0 }
 0x24b   : > { %v882_v20 = vsel %vm874_vm5, %v868_v9, %v878_v13  ;;  %v962_v13 = vld [vmem:[%s3296_s10 + $0x40] sm:$0xff] }
 0x24c   : > { %v910_v23 = vmul.f32 %v901_v7, %v882_v20 }
 0x24e   : > { %v869_v16 = vpop.f32.mrf.mxu1  ;;  %v3042_v29 = vadd.f32 %v929_v10, %v910_v23 }
 0x24f   : > { %v870_v19 = vadd.f32 %v869_v16, %v834_v3  ;;  %v1004_v7 = vpop.permute.xlu1 %1003 }
 0x251   : > { %vm875_vm8 = vcmp.ge.f32.partialorder %v870_v19, 0.0  ;;  %v879_v22 = vmul.f32 0.01, %v870_v19 }
 0x253   : > { %v883_v26 = vsel %vm875_vm8, %v870_v19, %v879_v22 }
 0x254   : > { %v911_v27 = vmul.f32 %v906_v6, %v883_v26 }
 0x256   : > { %v3044_v30 = vadd.f32 %v934_v17, %v911_v27 }
 0x258   : > { %v941_v33 = vpack.c.bf16 %v3044_v30, %v3042_v29 }
 0x25a   : > { %1081 = vmatpush.bf16.msra.mxu2 %v941_v33 }
 0x25e   : > { %1082 = vmatpush.bf16.msra.mxu2 %v940_v37 }
 0x261   : > { %2470 = vmatmul.msk.bf16.vlgmr.msra.gmra.mxu2 %vm1056_vm9, %v2517_v38 }
 0x271   : > { %2471 = vmatmul.msk.bf16.gmra.mxu2 %vm1056_vm9, %v2518_v39 }
 0x281   : > { %2472 = vmatmul.msk.bf16.gmra.mxu2 %vm1056_vm9, %v2519_v40 }
 0x291   : > { %2473 = vmatmul.msk.bf16.gmra.mxu2 %vm1056_vm9, %v2520_v41 }
 0x2a1   : > { %2474 = vmatmul.msk.bf16.gmra.mxu2 %vm1056_vm9, %v2521_v62 }
 0x2b1   : > { %2475 = vmatmul.msk.bf16.gmra.mxu2 %vm1056_vm9, %v2522_v5 }
 0x2e4   : > { %v1084_v43 = vpop.f32.mrf.mxu2 }
 0x2e5   : > { %v1085_v45 = vadd.f32 %v1084_v43, %v969_v44 }
 0x2e7   : > { %v1114_v49 = vmul.f32 0.35355338, %v1085_v45 }
 0x2ec   : > { %v1086_v47 = vpop.f32.mrf.mxu2 }
 0x2ed   : > { %v1087_v48 = vadd.f32 %v1086_v47, %v974_v46 }
 0x2ef   : > { %v1115_v50 = vmul.f32 0.35355338, %v1087_v48 }
 0x2f1   : > { %v2600_v51 = vpack.i.bf16 %v1115_v50, %v1114_v49 }
 0x2f3   : > { %2601 = vxpose.xlu2.b32.start.end [1/1] (short) (narrow) %v2600_v51, 16 }
 0x2f4   : > { %v1089_v53 = vpop.f32.mrf.mxu2 }
 0x2f5   : > { %v1090_v55 = vadd.f32 %v1089_v53, %v979_v54 }
 0x2f7   : > { %v1116_v59 = vmul.f32 0.35355338, %v1090_v55 }
 0x2fc   : > { %v1091_v57 = vpop.f32.mrf.mxu2 }
 0x2fd   : > { %v1092_v58 = vadd.f32 %v1091_v57, %v984_v56 }
 0x2ff   : > { %v1117_v60 = vmul.f32 0.35355338, %v1092_v58 }
 0x301   : > { %v2612_v61 = vpack.i.bf16 %v1117_v60, %v1116_v59 }
 0x303   : > { %2613 = vxpose.xlu2.b32.start.end [1/1] (short) (narrow) %v2612_v61, 16 }
 0x304   : > { %v1094_v63 = vpop.f32.mrf.mxu2 }
 0x305   : > { %v1095_v2 = vadd.f32 %v1094_v63, %v989_v42 }
 0x30c   : > { %v1096_v1 = vpop.f32.mrf.mxu2 }
 0x30d   : > { %v1097_v3 = vadd.f32 %v1096_v1, %v994_v0 }
 0x30f   : > { %v2588_v4 = vpack.i.bf16 %v1097_v3, %v1095_v2 }
 0x311   : > { %2589 = vxpose.xlu1.b32.start.end [1/1] (short) (narrow) %v2588_v4, 16 }
 0x314   : > { %v1099_v6 = vpop.f32.mrf.mxu2 }
 0x315   : > { %v1100_v9 = vadd.f32 %v1099_v6, %v999_v52 }
 0x31c   : > { %v1101_v8 = vpop.f32.mrf.mxu2 }
 0x31d   : > { %v1102_v10 = vadd.f32 %v1101_v8, %v1004_v7 }
 0x31f   : > { %v2624_v11 = vpack.i.bf16 %v1102_v10, %v1100_v9 }
 0x321   : > { %2625 = vxpose.xlu0.b32.start.end [1/1] (short) (narrow) %v2624_v11, 16 }
 0x373   : > { %1018 = vperm.xlu1 %2575, %v964_v12  }
 0x374   : > { %1008 = vperm.xlu2 %2576, %v962_v13  }
 0x38c   : > { %v2602_v14 = vpop.trf.xlu2 }
 0x38d   : > { %v2603_v26 = vunpack.i.l.bf16 %v2602_v14  ;;  %v2606_v32 = vunpack.i.h.bf16 %v2602_v14 }
 0x38f   : > { %v1246_v40 = vpack.c.bf16 %v2603_v26, %v2603_v26  ;;  %v1248_v44 = vpack.c.bf16 %v2606_v32, %v2606_v32 }
 0x391   : > { %v1528_v50 = vunpack.c.l.b16 %v1246_v40  ;;  %v1559_v53 = vunpack.c.l.b16 %v1248_v44 }
 0x394   : > { %v2607_v15 = vpop.trf.xlu2 }
 0x395   : > { %v2608_v27 = vunpack.i.l.bf16 %v2607_v15  ;;  %v2611_v33 = vunpack.i.h.bf16 %v2607_v15 }
 0x397   : > { %v1247_v41 = vpack.c.bf16 %v2608_v27, %v2608_v27  ;;  %v1249_v45 = vpack.c.bf16 %v2611_v33, %v2611_v33 }
 0x399   : > { %v1529_v51 = vunpack.c.l.b16 %v1247_v41  ;;  %v1560_v54 = vunpack.c.l.b16 %v1249_v45  ;;  %v963_v41 = vld [vmem:[%s3296_s10 + $0x48] sm:$0xff] }
 0x39b   : > { %v1530_v56 = vpack.c.b16 %v1529_v51, %v1528_v50  ;;  %v1561_v61 = vpack.c.b16 %v1560_v54, %v1559_v53 }
 0x39c   : > { %v2614_v16 = vpop.trf.xlu2 }
 0x39d   : > { %v2615_v58 = vunpack.i.l.bf16 %v2614_v16  ;;  %v2618_v0 = vunpack.i.h.bf16 %v2614_v16 }
 0x39f   : > { %v1250_v6 = vpack.c.bf16 %v2615_v58, %v2615_v58  ;;  %v1252_v10 = vpack.c.bf16 %v2618_v0, %v2618_v0 }
 0x3a1   : > { %v1589_v14 = vunpack.c.l.b16 %v1250_v6 }
 0x3a4   : > { %v2619_v17 = vpop.trf.xlu2 }
 0x3a5   : > { %v2620_v59 = vunpack.i.l.bf16 %v2619_v17  ;;  %v2623_v1 = vunpack.i.h.bf16 %v2619_v17  ;;  %v1619_v17 = vunpack.c.l.b16 %v1252_v10 }
 0x3a7   : > { %v1251_v7 = vpack.c.bf16 %v2620_v59, %v2620_v59  ;;  %v1253_v11 = vpack.c.bf16 %v2623_v1, %v2623_v1 }
 0x3a9   : > { %v1590_v15 = vunpack.c.l.b16 %v1251_v7 }
 0x3b5   : > { %v2590_v18 = vpop.trf.xlu1 }
 0x3b6   : > { %v2591_v19 = vunpack.i.l.bf16 %v2590_v18  ;;  %v2594_v20 = vunpack.i.h.bf16 %v2590_v18 }
 0x3b8   : > { %v1382_v22 = vpack.c.bf16 %v2591_v19, %v2591_v19  ;;  %v1384_v23 = vpack.c.bf16 %v2594_v20, %v2594_v20  ;;  %v1620_v19 = vunpack.c.l.b16 %v1253_v11  ;;  %v1591_v20 = vpack.c.b16 %v1590_v15, %v1589_v14 }
 0x3ba   : > { %v1533_v37 = vunpack.c.l.b16 %v1382_v22  ;;  %v1564_v39 = vunpack.c.l.b16 %v1384_v23 }
 0x3bd   : > { %v2595_v21 = vpop.trf.xlu1 }
 0x3be   : > { %v2596_v24 = vunpack.i.l.bf16 %v2595_v21  ;;  %v2599_v25 = vunpack.i.h.bf16 %v2595_v21  ;;  %v1621_v21 = vpack.c.b16 %v1620_v19, %v1619_v17 }
 0x3c0   : > { %v1383_v28 = vpack.c.bf16 %v2596_v24, %v2596_v24  ;;  %v1385_v31 = vpack.c.bf16 %v2599_v25, %v2599_v25 }
 0x3c2   : > { %v1534_v35 = vunpack.c.l.b16 %v1383_v28  ;;  %v1565_v38 = vunpack.c.l.b16 %v1385_v31 }
 0x3c4   : > { %v1535_v42 = vpack.c.b16 %v1534_v35, %v1533_v37  ;;  %v1566_v43 = vpack.c.b16 %v1565_v38, %v1564_v39  ;;  %v965_v35 = vld [vmem:[%s3296_s10 + $0x58] sm:$0xff] }
 0x3c5   : > { %v2626_v46 = vpop.trf.xlu0 }
 0x3c6   : > { %v1541_v47 = vsel %vm1536_vm10, %v1535_v42, 0  ;;  %v1571_v48 = vsel %vm1536_vm10, %v1566_v43, 0  ;;  %v2630_v49 = vunpack.i.h.bf16 %v2626_v46  ;;  %v2627_v52 = vunpack.i.l.bf16 %v2626_v46 }
 0x3c7   : > { %1550 = vmatpush.bf16.xpose.msra.mxu3 %v1541_v47  ;;  %1580 = vmatpush.bf16.xpose.msrb.mxu0 %v1571_v48 }
 0x3c8   : > { %v1388_v55 = vpack.c.bf16 %v2630_v49, %v2630_v49  ;;  %v1386_v57 = vpack.c.bf16 %v2627_v52, %v2627_v52 }
 0x3ca   : > { %v1624_v2 = vunpack.c.l.b16 %v1388_v55  ;;  %v1594_v5 = vunpack.c.l.b16 %v1386_v57 }
 0x3cd   : > { %v2631_v60 = vpop.trf.xlu0 }
 0x3ce   : > { %v2635_v62 = vunpack.i.h.bf16 %v2631_v60  ;;  %2476 = vmatmul.msk.bf16.vlgmr.msra.gmra.mxu3 %vm1536_vm10, %v1530_v56  ;;  %v2632_v63 = vunpack.i.l.bf16 %v2631_v60  ;;  %2477 = vmatmul.msk.bf16.vlgmr.msrb.gmra.mxu0 %vm1536_vm10, %v1561_v61  ;;  %v1009_v47 = vpop.permute.xlu2 %1008 }
 0x3d0   : > { %v1389_v3 = vpack.c.bf16 %v2635_v62, %v2635_v62  ;;  %v1387_v4 = vpack.c.bf16 %v2632_v63, %v2632_v63 }
 0x3d2   : > { %v1625_v8 = vunpack.c.l.b16 %v1389_v3  ;;  %v1595_v9 = vunpack.c.l.b16 %v1387_v4 }
 0x3d4   : > { %v1596_v12 = vpack.c.b16 %v1595_v9, %v1594_v5  ;;  %v1626_v13 = vpack.c.b16 %v1625_v8, %v1624_v2 }
 0x3d6   : > { %v1601_v18 = vsel %vm1536_vm10, %v1596_v12, 0  ;;  %v1631_v16 = vsel %vm1536_vm10, %v1626_v13, 0  ;;  %v1104_v13 = vpop.f32.mrf.mxu2 }
 0x3d7   : > { %1610 = vmatpush.bf16.xpose.msrb.mxu3 %v1601_v18  ;;  %1640 = vmatpush.bf16.xpose.msra.mxu0 %v1631_v16  ;;  %v1105_v15 = vadd.f32 %v1104_v13, %v1009_v47 }
 0x3de   : > { %2478 = vmatmul.msk.bf16.vlgmr.msrb.gmra.mxu3 %vm1536_vm10, %v1591_v20  ;;  %2479 = vmatmul.msk.bf16.vlgmr.msra.gmra.mxu0 %vm1536_vm10, %v1621_v21 }
 0x3e5   : > { %v3112_v44 = vpop.permute.xlu1 %1018 }
 0x44b   : > { %v3092_v22 = vpop.f32.mrf.mxu0 }
 0x44c   : > { %v1655_v42 = vsel %vm1647_vm11, %v3092_v22, -inf }
 0x451   : > { %v1552_v23 = vpop.f32.mrf.mxu3 }
 0x452   : > { %v1648_v24 = vsel %vm1647_vm11, %v1552_v23, -inf }
 0x453   : > { %1649 = vmax.xlane.f32.xlu0 %v1648_v24  ;;  %v1584_v25 = vpop.f32.mrf.mxu0 }
 0x454   : > { %v1658_v33 = vsel %vm1651_vm12, %v1584_v25, -inf }
 0x459   : > { %v1554_v26 = vpop.f32.mrf.mxu3 }
 0x45a   : > { %v1652_v27 = vsel %vm1651_vm12, %v1554_v26, -inf }
 0x45b   : > { %1653 = vmax.xlane.f32.xlu1 %v1652_v27  ;;  %v1642_v28 = vpop.f32.mrf.mxu0 }
 0x45c   : > { %v1667_v31 = vsel %vm1647_vm11, %v1642_v28, -inf }
 0x45d   : > { %1668 = vmax.xlane.f32.xlu2 %v1667_v31 }
 0x461   : > { %v3097_v32 = vpop.f32.mrf.mxu3 }
 0x462   : > { %v1661_v43 = vsel %vm1647_vm11, %v3097_v32, -inf }
 0x463   : > { %1659 = vmax.xlane.f32.xlu1 %v1658_v33  ;;  %v1644_v39 = vpop.f32.mrf.mxu0 }
 0x464   : > { %v1670_v40 = vsel %vm1651_vm12, %v1644_v39, -inf }
 0x467   : > { %1023 = vperm.xlu0 %2577, %v965_v35  }
 0x469   : > { %v1614_v37 = vpop.f32.mrf.mxu3 }
 0x46a   : > { %v1664_v38 = vsel %vm1651_vm12, %v1614_v37, -inf }
 0x46b   : > { %1665 = vmax.xlane.f32.xlu1 %v1664_v38 }
 0x473   : > { %1671 = vmax.xlane.f32.xlu1 %v1670_v40 }
 0x475   : > { %1013 = vperm.xlu2 %2576, %v963_v41  }
 0x491   : > { %1656 = vmax.xlane.f32.xlu0 %v1655_v42 }
 0x499   : > { %1662 = vmax.xlane.f32.xlu0 %v1661_v43 }
 0x4c6   : > { %v1650_v45 = vpop.xlane.xlu0 %1649 }
 0x4c7   : > { %v1673_v46 = vsub.f32 %v1552_v23, %v1650_v45 }
 0x4c9   : > { %v1681_v48 = vmul.f32 1.442695, %v1673_v46 }
 0x4cb   : > { %2666 = vpow2.f32 %v1681_v48 }
 0x4ce   : > { %v1654_v49 = vpop.xlane.xlu1 %1653 }
 0x4cf   : > { %v1674_v50 = vsub.f32 %v1554_v26, %v1654_v49 }
 0x4d0   : > { %v1669_v53 = vpop.xlane.xlu2 %1668 }
 0x4d1   : > { %v3114_v51 = vpop.eup %2666  ;;  %v1683_v52 = vmul.f32 1.442695, %v1674_v50  ;;  %v1679_v54 = vsub.f32 %v1642_v28, %v1669_v53 }
 0x4d2   : > { %v1697_v55 = vsel %vm1647_vm11, %v3114_v51, 0.0 }
 0x4d3   : > { %2668 = vpow2.f32 %v1683_v52  ;;  %1698 = vadd.xlane.f32.xlu0 %v1697_v55  ;;  %v1693_v56 = vmul.f32 1.442695, %v1679_v54 }
 0x4d5   : > { %2670 = vpow2.f32 %v1693_v56 }
 0x4d6   : > { %v1660_v57 = vpop.xlane.xlu1 %1659 }
 0x4d7   : > { %v1676_v58 = vsub.f32 %v1584_v25, %v1660_v57  ;;  %v1106_v25 = vpop.f32.mrf.mxu2 }
 0x4d8   : > { %v1014_v23 = vpop.permute.xlu2 %1013 }
 0x4d9   : > { %v3118_v59 = vpop.eup %2668  ;;  %v1687_v60 = vmul.f32 1.442695, %v1676_v58  ;;  %v1024_v12 = vpop.permute.xlu0 %1023  ;;  %v1107_v26 = vadd.f32 %v1106_v25, %v1014_v23  ;;  %v2075_v25 = vld [vmem:[%s3299_s13] sm:$0xff] }
 0x4da   : > { %v1700_v61 = vsel %vm1651_vm12, %v3118_v59, 0.0 }
 0x4db   : > { %2672 = vpow2.f32 %v1687_v60  ;;  %1701 = vadd.xlane.f32.xlu1 %v1700_v61  ;;  %v3122_v62 = vpop.eup %2670 }
 0x4dc   : > { %v1715_v63 = vsel %vm1647_vm11, %v3122_v62, 0.0 }
 0x4dd   : > { %1716 = vadd.xlane.f32.xlu0 %v1715_v63 }
 0x4de   : > { %v1666_v0 = vpop.xlane.xlu1 %1665 }
 0x4df   : > { %v1678_v1 = vsub.f32 %v1614_v37, %v1666_v0  ;;  %v1109_v31 = vpop.f32.mrf.mxu2 }
 0x4e1   : > { %v3126_v2 = vpop.eup %2672  ;;  %v1691_v3 = vmul.f32 1.442695, %v1678_v1 }
 0x4e2   : > { %v1706_v4 = vsel %vm1651_vm12, %v3126_v2, 0.0 }
 0x4e3   : > { %2674 = vpow2.f32 %v1691_v3  ;;  %1707 = vadd.xlane.f32.xlu2 %v1706_v4 }
 0x4e6   : > { %v1672_v5 = vpop.xlane.xlu1 %1671 }
 0x4e7   : > { %v1680_v6 = vsub.f32 %v1644_v39, %v1672_v5 }
 0x4e9   : > { %v2675_v7 = vpop.eup %2674  ;;  %v1695_v8 = vmul.f32 1.442695, %v1680_v6 }
 0x4ea   : > { %v1712_v9 = vsel %vm1651_vm12, %v2675_v7, 0.0 }
 0x4eb   : > { %2676 = vpow2.f32 %v1695_v8  ;;  %1713 = vadd.xlane.f32.xlu2 %v1712_v9 }
 0x4f1   : > { %v3131_v10 = vpop.eup %2676 }
 0x4f2   : > { %v1718_v11 = vsel %vm1651_vm12, %v3131_v10, 0.0 }
 0x4f3   : > { %1719 = vadd.xlane.f32.xlu2 %v1718_v11 }
 0x504   : > { %v1657_v14 = vpop.xlane.xlu0 %1656 }
 0x505   : > { %v1675_v17 = vsub.f32 %v3092_v22, %v1657_v14  ;;  %v1110_v22 = vadd.f32 %v1109_v31, %v3112_v44  ;;  %v2103_v31 = vld [vmem:[%s3300_s14] sm:$0xff] }
 0x506   : > { %1390 = vxpose.xlu0.b32.start.end [1/1] (short) (narrow) %v1105_v15, 16 }
 0x507   : > { %v1685_v20 = vmul.f32 1.442695, %v1675_v17 }
 0x50c   : > { %v1663_v18 = vpop.xlane.xlu0 %1662 }
 0x50d   : > { %v1677_v16 = vsub.f32 %v3097_v32, %v1663_v18  ;;  %v1111_v32 = vpop.f32.mrf.mxu2 }
 0x50e   : > { %v1112_v33 = vadd.f32 %v1111_v32, %v1024_v12  ;;  %v2077_v32 = vld [vmem:[%s3299_s13 + $0x10] sm:$0xff] }
 0x50f   : > { %v1689_v19 = vmul.f32 1.442695, %v1677_v16 }
 0x510   : > { %v2636_v35 = vpack.i.bf16 %v1110_v22, %v1112_v33  ;;  %v2106_v33 = vld [vmem:[%s3300_s14 + $0x18] sm:$0xff] }
 0x511   : > { %2678 = vpow2.f32 %v1689_v19 }
 0x512   : > { %2680 = vpow2.f32 %v1685_v20 }
 0x517   : > { %v2679_v21 = vpop.eup %2678 }
 0x518   : > { %v1709_v24 = vsel %vm1647_vm11, %v2679_v21, 0.0  ;;  %v2681_v27 = vpop.eup %2680 }
 0x519   : > { %1710 = vadd.xlane.f32.xlu1 %v1709_v24  ;;  %v1703_v28 = vsel %vm1647_vm11, %v2681_v27, 0.0 }
 0x51c   : > { %1422 = vxpose.xlu2.b32.start.end [1/1] (short) (narrow) %v1107_v26, 16 }
 0x521   : > { %1704 = vadd.xlane.f32.xlu1 %v1703_v28 }
 0x546   : > { %v1699_v50 = vpop.xlane.xlu0 %1698 }
 0x54e   : > { %v1702_v38 = vpop.xlane.xlu1 %1701 }
 0x550   : > { %v1717_v52 = vpop.xlane.xlu0 %1716 }
 0x556   : > { %v1708_v37 = vpop.xlane.xlu2 %1707 }
 0x55b   : > { %2637 = vxpose.xlu1.b32.start.end [1/1] (short) (narrow) %v2636_v35, 16 }
 0x55e   : > { %v1714_v39 = vpop.xlane.xlu2 %1713 }
 0x55f   : > { %2682 = vrcp.f32 %v1714_v39 }
 0x565   : > { %v2683_v41 = vpop.eup %2682 }
 0x566   : > { %v1734_v42 = vmul.f32 %v2683_v41, %v2675_v7  ;;  %v1720_v55 = vpop.xlane.xlu2 %1719 }
 0x568   : > { %v1742_v45 = vpack.c.bf16 %v1734_v42, %v1734_v42 }
 0x56a   : > { %v3140_v48 = vunpack.c.l.b16 %v1742_v45 }
 0x58c   : > { %v1711_v40 = vpop.xlane.xlu1 %1710 }
 0x58d   : > { %2684 = vrcp.f32 %v1711_v40 }
 0x58e   : > { %2686 = vrcp.f32 %v1702_v38 }
 0x58f   : > { %2688 = vrcp.f32 %v1699_v50 }
 0x593   : > { %v2685_v43 = vpop.eup %2684 }
 0x594   : > { %v1733_v46 = vmul.f32 %v2685_v43, %v2679_v21  ;;  %v2687_v54 = vpop.eup %2686  ;;  %v1705_v56 = vpop.xlane.xlu1 %1704 }
 0x595   : > { %v2689_v57 = vpop.eup %2688  ;;  %v1730_v58 = vmul.f32 %v2687_v54, %v3118_v59  ;;  %2690 = vrcp.f32 %v1705_v56 }
 0x596   : > { %v1741_v47 = vpack.c.bf16 %v1733_v46, %v1733_v46  ;;  %v1729_v61 = vmul.f32 %v2689_v57, %v3114_v51  ;;  %2692 = vrcp.f32 %v1708_v37  ;;  %v2001_v51 = vld [vmem:[%s3298_s12 + $0x8] sm:$0xff] }
 0x597   : > { %v1738_v0 = vpack.c.bf16 %v1730_v58, %v1730_v58  ;;  %2694 = vrcp.f32 %v1720_v55 }
 0x598   : > { %v3142_v49 = vunpack.c.l.b16 %v1741_v47  ;;  %v1737_v5 = vpack.c.bf16 %v1729_v61, %v1729_v61  ;;  %2696 = vrcp.f32 %v1717_v52 }
 0x599   : > { %v1748_v8 = vunpack.c.l.b16 %v1738_v0 }
 0x59a   : > { %v1810_v44 = vpack.c.b16 %v3140_v48, %v3142_v49  ;;  %v1747_v12 = vunpack.c.l.b16 %v1737_v5  ;;  %v2002_v48 = vld [vmem:[%s3298_s12 + $0x10] sm:$0xff]  ;;  %v2104_v49 = vld [vmem:[%s3300_s14 + $0x8] sm:$0xff] }
 0x59b   : > { %v2691_v7 = vpop.eup %2690 }
 0x59c   : > { %v2693_v11 = vpop.eup %2692  ;;  %v1731_v13 = vmul.f32 %v2691_v7, %v2681_v27  ;;  %v1749_v15 = vpack.c.b16 %v1748_v8, %v1747_v12 }
 0x59d   : > { %v1732_v18 = vmul.f32 %v2693_v11, %v3126_v2  ;;  %v2695_v35 = vpop.eup %2694 }
 0x59e   : > { %v1739_v17 = vpack.c.bf16 %v1731_v13, %v1731_v13  ;;  %v2697_v39 = vpop.eup %2696  ;;  %v1736_v40 = vmul.f32 %v2695_v35, %v3131_v10 }
 0x59f   : > { %v1740_v21 = vpack.c.bf16 %v1732_v18, %v1732_v18  ;;  %v1735_v41 = vmul.f32 %v2697_v39, %v3122_v62  ;;  %v2003_v18 = vld [vmem:[%s3298_s12 + $0x18] sm:$0xff] }
 0x5a0   : > { %v1778_v24 = vunpack.c.l.b16 %v1739_v17  ;;  %v1744_v50 = vpack.c.bf16 %v1736_v40, %v1736_v40  ;;  %v2105_v17 = vld [vmem:[%s3300_s14 + $0x10] sm:$0xff] }
 0x5a1   : > { %v1779_v27 = vunpack.c.l.b16 %v1740_v21  ;;  %v1743_v56 = vpack.c.bf16 %v1735_v41, %v1735_v41 }
 0x5a3   : > { %v1780_v2 = vpack.c.b16 %v1779_v27, %v1778_v24  ;;  %v1838_v0 = vunpack.c.l.b16 %v1743_v56  ;;  %v2523_v27 = vld [vmem:[%s3297_s11] sm:$0xff] }
 0x5aa   : > { %v1406_v53 = vpop.trf.xlu0 }
 0x5ab   : > { %v1518_v60 = vpack.c.bf16 %v1406_v53, %v1406_v53 }
 0x5ad   : > { %v1752_v1 = vunpack.c.l.b16 %v1518_v60  ;;  %v1839_v60 = vunpack.c.l.b16 %v1744_v50 }
 0x5b2   : > { %v1407_v63 = vpop.trf.xlu0 }
 0x5b3   : > { %v1519_v3 = vpack.c.bf16 %v1407_v63, %v1407_v63 }
 0x5b5   : > { %v1438_v4 = vpop.trf.xlu2  ;;  %v1753_v6 = vunpack.c.l.b16 %v1519_v3 }
 0x5b6   : > { %v1520_v59 = vpack.c.bf16 %v1438_v4, %v1438_v4 }
 0x5b7   : > { %v1754_v9 = vpack.c.b16 %v1753_v6, %v1752_v1  ;;  %v1840_v1 = vpack.c.b16 %v1839_v60, %v1838_v0 }
 0x5b8   : > { %v1783_v19 = vunpack.c.l.b16 %v1520_v59 }
 0x5b9   : > { %v1760_v14 = vsel %vm1758_vm13, %v1754_v9, 0 }
 0x5ba   : > { %1769 = vmatpush.bf16.msra.mxu3 %v1760_v14 }
 0x5bd   : > { %2011 = vperm.xlu1 %2575, %v2001_v51   ;;  %v1439_v16 = vpop.trf.xlu2  ;;  %2480 = vmatmul.msk.bf16.vlgmr.msra.gmra.mxu3 %vm1647_vm11, %v1749_v15  ;;  %v2000_v15 = vld [vmem:[%s3298_s12] sm:$0xff] }
 0x5be   : > { %v1521_v20 = vpack.c.bf16 %v1439_v16, %v1439_v16  ;;  %v2076_v16 = vld [vmem:[%s3299_s13 + $0x8] sm:$0xff] }
 0x5c0   : > { %v1784_v23 = vunpack.c.l.b16 %v1521_v20 }
 0x5c2   : > { %v1785_v26 = vpack.c.b16 %v1784_v23, %v1783_v19 }
 0x5c4   : > { %v1790_v28 = vsel %vm1758_vm13, %v1785_v26, 0 }
 0x5c5   : > { %2081 = vperm.xlu1 %2575, %v2075_v25   ;;  %1799 = vmatpush.bf16.msrb.mxu1 %v1790_v28  ;;  %v2524_v28 = vld [vmem:[%s3297_s11 + $0x8] sm:$0xff] }
 0x5c8   : > { %2481 = vmatmul.msk.bf16.vlgmr.msrb.gmra.mxu1 %vm1647_vm11, %v1780_v2 }
 0x5cd   : > { %2109 = vperm.xlu1 %2575, %v2103_v31  }
 0x5d5   : > { %2091 = vperm.xlu1 %2575, %v2077_v32  }
 0x5dd   : > { %2124 = vperm.xlu1 %2575, %v2106_v33  }
 0x5ff   : > { %v2638_v22 = vpop.trf.xlu1 }
 0x600   : > { %v2642_v37 = vunpack.i.h.bf16 %v2638_v22  ;;  %v2639_v38 = vunpack.i.l.bf16 %v2638_v22 }
 0x602   : > { %v1522_v42 = vpack.c.bf16 %v2642_v37, %v2642_v37  ;;  %v1524_v43 = vpack.c.bf16 %v2639_v38, %v2639_v38 }
 0x604   : > { %v1813_v55 = vunpack.c.l.b16 %v1522_v42  ;;  %v1843_v52 = vunpack.c.l.b16 %v1524_v43 }
 0x607   : > { %v2643_v45 = vpop.trf.xlu1 }
 0x608   : > { %v2647_v46 = vunpack.i.h.bf16 %v2643_v45  ;;  %v2644_v47 = vunpack.i.l.bf16 %v2643_v45 }
 0x60a   : > { %v1523_v53 = vpack.c.bf16 %v2647_v46, %v2647_v46  ;;  %v1525_v54 = vpack.c.bf16 %v2644_v47, %v2644_v47 }
 0x60c   : > { %v1814_v57 = vunpack.c.l.b16 %v1523_v53  ;;  %v1844_v58 = vunpack.c.l.b16 %v1525_v54 }
 0x60e   : > { %v1815_v61 = vpack.c.b16 %v1814_v57, %v1813_v55  ;;  %v1845_v63 = vpack.c.b16 %v1844_v58, %v1843_v52 }
 0x610   : > { %v1820_v10 = vsel %vm1758_vm13, %v1815_v61, 0  ;;  %v1850_v62 = vsel %vm1758_vm13, %v1845_v63, 0 }
 0x611   : > { %1829 = vmatpush.bf16.msrb.mxu0 %v1820_v10  ;;  %1859 = vmatpush.bf16.msrb.mxu3 %v1850_v62 }
 0x614   : > { %2482 = vmatmul.msk.bf16.vlgmr.msrb.gmra.mxu0 %vm1647_vm11, %v1810_v44  ;;  %2483 = vmatmul.msk.bf16.vlgmr.msrb.gmra.mxu3 %vm1647_vm11, %v1840_v1  ;;  %v2078_v44 = vld [vmem:[%s3299_s13 + $0x18] sm:$0xff] }
 0x62f   : > { %v2012_v2 = vpop.permute.xlu1 %2011 }
 0x637   : > { %v2082_v32 = vpop.permute.xlu1 %2081 }
 0x63f   : > { %v2110_v43 = vpop.permute.xlu1 %2109 }
 0x640   : > { %v1771_v3 = vpop.f32.mrf.mxu3 }
 0x645   : > { %v1801_v4 = vpop.f32.mrf.mxu1 }
 0x646   : > { %v2657_v5 = vpack.i.bf16 %v1801_v4, %v1771_v3 }
 0x647   : > { %v2092_v10 = vpop.permute.xlu1 %2091 }
 0x648   : > { %2658 = vxpose.xlu2.b32.start [1/2] (short) (narrow) %v2657_v5, 8  ;;  %v1773_v6 = vpop.f32.mrf.mxu3 }
 0x64d   : > { %v1803_v7 = vpop.f32.mrf.mxu1 }
 0x64e   : > { %v2659_v8 = vpack.i.bf16 %v1803_v7, %v1773_v6 }
 0x650   : > { %2660 = vxpose.xlu2.b32.end [2/2] (short) (narrow) %v2659_v8, 8 }
 0x691   : > { %v1831_v9 = vpop.f32.mrf.mxu0 }
 0x697   : > { %v1861_v11 = vpop.f32.mrf.mxu3 }
 0x698   : > { %v2648_v12 = vpack.i.bf16 %v1861_v11, %v1831_v9 }
 0x699   : > { %v1833_v13 = vpop.f32.mrf.mxu0 }
 0x69a   : > { %2649 = vxpose.xlu0.b32.start [1/2] (short) (narrow) %v2648_v12, 8  ;;  %v2125_v12 = vpop.permute.xlu1 %2124 }
 0x69f   : > { %v1863_v59 = vpop.f32.mrf.mxu3 }
 0x6a0   : > { %v2650_v14 = vpack.i.bf16 %v1863_v59, %v1833_v13  ;;  %v2778_v59 = vmov 10.0  }
 0x6a1   : > { %2698 = vrcp.f32 %v2778_v59 }
 0x6a2   : > { %2651 = vxpose.xlu0.b32.end [2/2] (short) (narrow) %v2650_v14, 8 }
 0x6a7   : > { %v2699_v14 = vpop.eup %2698 }
 0x6a8   : > { %vm2148_vm2 = vweird.f32 %v2699_v14 }
 0x6b9   : > { %2016 = vperm.xlu2 %2576, %v2002_v48   ;;  %v2144_v48 = vmul.f32 10.0, %v2699_v14 }
 0x6c1   : > { %2114 = vperm.xlu2 %2576, %v2104_v49   ;;  %v2145_v49 = vsub.f32 1.0, %v2144_v48 }
 0x6c9   : > { %2096 = vperm.xlu2 %2576, %v2078_v44   ;;  %v2146_v44 = vmul.f32 %v2699_v14, %v2145_v49 }
 0x6e1   : > { %v2661_v51 = vpop.trf.xlu2 }
 0x6e2   : > { %v2665_v19 = vunpack.i.h.bf16 %v2661_v51  ;;  %v2662_v20 = vunpack.i.l.bf16 %v2661_v51  ;;  %v2147_v51 = vadd.f32 %v2699_v14, %v2146_v44 }
 0x6e4   : > { %v1998_v26 = vpack.c.bf16 %v2665_v19, %v2662_v20 }
 0x710   : > { %2006 = vperm.xlu0 %2577, %v2000_v15   ;;  %v2149_v15 = vsel %vm2148_vm2, %v2699_v14, %v2147_v51 }
 0x713   : > { %v2017_v40 = vpop.permute.xlu2 %2016 }
 0x718   : > { %2021 = vperm.xlu0 %2577, %v2003_v18  }
 0x71b   : > { %v2115_v57 = vpop.permute.xlu2 %2114 }
 0x720   : > { %2086 = vperm.xlu0 %2577, %v2076_v16  }
 0x723   : > { %v2097_v9 = vpop.permute.xlu2 %2096 }
 0x728   : > { %2119 = vperm.xlu0 %2577, %v2105_v17  }
 0x73e   : > { %v2652_v21 = vpop.trf.xlu0 }
 0x73f   : > { %v2656_v23 = vunpack.i.h.bf16 %v2652_v21  ;;  %v2653_v24 = vunpack.i.l.bf16 %v2652_v21 }
 0x741   : > { %v1999_v25 = vpack.c.bf16 %v2656_v23, %v2653_v24 }
 0x743   : > { %2046 = vmatpush.bf16.msra.mxu1 %v1999_v25 }
 0x747   : > { %2047 = vmatpush.bf16.msra.mxu1 %v1998_v26 }
 0x74a   : > { %2492 = vmatmul.msk.bf16.vlgmr.msra.gmra.mxu1 %vm1056_vm9, %v2523_v27 }
 0x75a   : > { %2493 = vmatmul.msk.bf16.gmra.mxu1 %vm1056_vm9, %v2524_v28 }
 0x782   : > { %v2007_v31 = vpop.permute.xlu0 %2006 }
 0x78a   : > { %v2022_v37 = vpop.permute.xlu0 %2021 }
 0x792   : > { %v2087_v56 = vpop.permute.xlu0 %2086 }
 0x79a   : > { %v2120_v3 = vpop.permute.xlu0 %2119 }
 0x7c7   : > { %v2049_v33 = vpop.f32.mrf.mxu1 }
 0x7c8   : > { %v2050_v22 = vadd.f32 %v2049_v33, %v2007_v31 }
 0x7ca   : > { %vm2059_vm14 = vcmp.ge.f32.partialorder %v2050_v22, 0.0  ;;  %v2063_v35 = vmul.f32 0.01, %v2050_v22 }
 0x7cc   : > { %v2067_v38 = vsel %vm2059_vm14, %v2050_v22, %v2063_v35 }
 0x7cd   : > { %v2071_v39 = vadd.f32 %v2067_v38, %v3050_v36  ;;  %v2779_v38 = vmov 9.0  }
 0x7ce   : > { %2700 = vrcp.f32 %v2779_v38 }
 0x7cf   : > { %v2051_v41 = vpop.f32.mrf.mxu1  ;;  %v2099_v42 = vmul.f32 %v2082_v32, %v2071_v39 }
 0x7d0   : > { %v2052_v45 = vadd.f32 %v2051_v41, %v2012_v2 }
 0x7d1   : > { %v2127_v46 = vadd.f32 %v2110_v43, %v2099_v42 }
 0x7d2   : > { %vm2060_vm15 = vcmp.ge.f32.partialorder %v2052_v45, 0.0  ;;  %v2064_v47 = vmul.f32 0.01, %v2052_v45 }
 0x7d3   : > { %v2131_v50 = vsel %vm1647_vm11, %v2127_v46, 0.0 }
 0x7d4   : > { %v2068_v53 = vsel %vm2060_vm15, %v2052_v45, %v2064_v47  ;;  %2132 = vadd.xlane.f32.xlu0 %v2131_v50  ;;  %v2701_v39 = vpop.eup %2700 }
 0x7d5   : > { %v2072_v54 = vadd.f32 %v2068_v53, %v3048_v34  ;;  %vm2179_vm3 = vweird.f32 %v2701_v39 }
 0x7d7   : > { %v2054_v55 = vpop.f32.mrf.mxu1  ;;  %v2100_v52 = vmul.f32 %v2087_v56, %v2072_v54 }
 0x7d8   : > { %v2055_v58 = vadd.f32 %v2054_v55, %v2017_v40  ;;  %v2175_v40 = vmul.f32 9.0, %v2701_v39 }
 0x7d9   : > { %v2128_v36 = vadd.f32 %v2115_v57, %v2100_v52 }
 0x7da   : > { %vm2061_vm0 = vcmp.ge.f32.partialorder %v2055_v58, 0.0  ;;  %v2065_v60 = vmul.f32 0.01, %v2055_v58  ;;  %v2176_v41 = vsub.f32 1.0, %v2175_v40 }
 0x7db   : > { %v2134_v61 = vsel %vm1647_vm11, %v2128_v36, 0.0 }
 0x7dc   : > { %v2069_v63 = vsel %vm2061_vm0, %v2055_v58, %v2065_v60  ;;  %2135 = vadd.xlane.f32.xlu2 %v2134_v61  ;;  %v2177_v42 = vmul.f32 %v2701_v39, %v2176_v41 }
 0x7dd   : > { %v2073_v0 = vadd.f32 %v2069_v63, %v3042_v29 }
 0x7de   : > { %v2178_v43 = vadd.f32 %v2701_v39, %v2177_v42 }
 0x7df   : > { %v2056_v62 = vpop.f32.mrf.mxu1  ;;  %v2101_v1 = vmul.f32 %v2092_v10, %v2073_v0 }
 0x7e0   : > { %v2057_v4 = vadd.f32 %v2056_v62, %v2022_v37  ;;  %v2180_v45 = vsel %vm2179_vm3, %v2701_v39, %v2178_v43  ;;  %v2270_v39 = vld [vmem:[%s3302_s16] sm:$0x1] }
 0x7e1   : > { %v2129_v34 = vadd.f32 %v2120_v3, %v2101_v1  ;;  %v2525_v3 = vld [vmem:[%s3301_s15] sm:$0xff] }
 0x7e2   : > { %vm2062_vm1 = vcmp.ge.f32.partialorder %v2057_v4, 0.0  ;;  %v2066_v5 = vmul.f32 0.01, %v2057_v4  ;;  %v2307_v43 = vld [vmem:[%s3303_s17] sm:$0x1] }
 0x7e3   : > { %v2137_v6 = vsel %vm1647_vm11, %v2129_v34, 0.0 }
 0x7e4   : > { %v2070_v7 = vsel %vm2062_vm1, %v2057_v4, %v2066_v5  ;;  %2138 = vadd.xlane.f32.xlu1 %v2137_v6 }
 0x7e5   : > { %v2074_v8 = vadd.f32 %v2070_v7, %v3044_v30 }
 0x7e7   : > { %v2102_v11 = vmul.f32 %v2097_v9, %v2074_v8  ;;  %v2286_v9 = vsel %vm2281_vm4, %v2525_v3, 0 }
 0x7e9   : > { %v2130_v13 = vadd.f32 %v2125_v12, %v2102_v11 }
 0x7eb   : > { %v2140_v29 = vsel %vm1647_vm11, %v2130_v13, 0.0 }
 0x7ec   : > { %2141 = vadd.xlane.f32.xlu0 %v2140_v29 }
 0x847   : > { %v2133_v18 = vpop.xlane.xlu0 %2132 }
 0x848   : > { %v2150_v16 = vmul.f32 %v2149_v15, %v2133_v18 }
 0x84a   : > { %v2154_v17 = vsub.f32 %v2127_v46, %v2150_v16 }
 0x84c   : > { %v2158_v30 = vmul.f32 %v2154_v17, %v2154_v17 }
 0x84e   : > { %v2162_v19 = vsel %vm1647_vm11, %v2158_v30, 0.0 }
 0x84f   : > { %v2136_v20 = vpop.xlane.xlu2 %2135  ;;  %2163 = vadd.xlane.f32.xlu2 %v2162_v19 }
 0x850   : > { %v2151_v21 = vmul.f32 %v2149_v15, %v2136_v20 }
 0x852   : > { %v2155_v23 = vsub.f32 %v2128_v36, %v2151_v21  ;;  %v2526_v36 = vld [vmem:[%s3301_s15 + $0x8] sm:$0xff] }
 0x853   : > { %v2289_v10 = vsel %vm2281_vm4, %v2526_v36, 0 }
 0x854   : > { %v2159_v24 = vmul.f32 %v2155_v23, %v2155_v23  ;;  %2297 = vmatpush.bf16.xpose.msra.mxu0 %v2289_v10 }
 0x856   : > { %v2165_v25 = vsel %vm1647_vm11, %v2159_v24, 0.0 }
 0x857   : > { %v2139_v26 = vpop.xlane.xlu1 %2138  ;;  %2166 = vadd.xlane.f32.xlu1 %v2165_v25 }
 0x858   : > { %v2152_v27 = vmul.f32 %v2149_v15, %v2139_v26 }
 0x85a   : > { %v2156_v28 = vsub.f32 %v2129_v34, %v2152_v27 }
 0x85c   : > { %v2160_v2 = vmul.f32 %v2156_v28, %v2156_v28  ;;  %2298 = vmatpush.bf16.xpose.msra.mxu0 %v2286_v9 }
 0x85e   : > { %v2168_v31 = vsel %vm1647_vm11, %v2160_v2, 0.0 }
 0x85f   : > { %2169 = vadd.xlane.f32.xlu0 %v2168_v31  ;;  %v2142_v32 = vpop.xlane.xlu0 %2141 }
 0x860   : > { %v2153_v33 = vmul.f32 %v2149_v15, %v2142_v32  ;;  %v2528_v32 = vld [vmem:[%s3305_s19 + $0x8] sm:$0xff] }
 0x862   : > { %v2157_v22 = vsub.f32 %v2130_v13, %v2153_v33 }
 0x864   : > { %v2161_v35 = vmul.f32 %v2157_v22, %v2157_v22 }
 0x866   : > { %v2171_v37 = vsel %vm1647_vm11, %v2161_v35, 0.0 }
 0x867   : > { %2172 = vadd.xlane.f32.xlu2 %v2171_v37  ;;  %v2527_v37 = vld [vmem:[%s3305_s19] sm:$0xff] }
 0x868   : > { %v2331_v38 = vsel %vm1056_vm9, %v2527_v37, 0 }
 0x891   : > { %2233 = vxpose.xlu1.b32.start [1/8] (short) (narrow) %v2150_v16, 8 }
 0x899   : > { %2234 = vxpose.xlu1.b32.cont [2/8] (short) (narrow) %v2151_v21, 8 }
 0x8a1   : > { %2235 = vxpose.xlu1.b32.cont [3/8] (short) (narrow) %v2152_v27, 8 }
 0x8a9   : > { %2236 = vxpose.xlu1.b32.cont [4/8] (short) (narrow) %v2153_v33, 8  ;;  %v2334_v33 = vsel %vm1056_vm9, %v2528_v32, 0 }
 0x8aa   : > { %2342 = vmatpush.bf16.xpose.msra.mxu3 %v2334_v33 }
 0x8b2   : > { %2343 = vmatpush.bf16.xpose.msra.mxu3 %v2331_v38 }
 0x8c2   : > { %v2164_v46 = vpop.xlane.xlu2 %2163 }
 0x8c3   : > { %v2181_v47 = vmul.f32 %v2180_v45, %v2164_v46  ;;  %v2309_v46 = vld [vmem:[%s3304_s18] sm:$0x1] }
 0x8c5   : > { %2702 = vrsqrt.f32 %v2181_v47  ;;  %vm2192_vm5 = vcmp.eq.f32.partialorder %v2181_v47, inf  ;;  %v2195_v4 = vand.u32 2147483648, %v2181_v47  ;;  %vm2194_vm6 = vcmp.eq.f32.partialorder %v2181_v47, 0.0 }
 0x8ca   : > { %v2167_v50 = vpop.xlane.xlu1 %2166 }
 0x8cb   : > { %v2703_v53 = vpop.eup %2702  ;;  %v2182_v54 = vmul.f32 %v2180_v45, %v2167_v50 }
 0x8cc   : > { %v2186_v56 = vmul.f32 %v2703_v53, %v2181_v47 }
 0x8cd   : > { %2704 = vrsqrt.f32 %v2182_v54  ;;  %vm2204_vm7 = vcmp.eq.f32.partialorder %v2182_v54, inf  ;;  %v2207_v48 = vand.u32 2147483648, %v2182_v54  ;;  %vm2206_vm8 = vcmp.eq.f32.partialorder %v2182_v54, 0.0 }
 0x8ce   : > { %v2187_v55 = vmul.f32 %v2703_v53, %v2186_v56  ;;  %v2316_v56 = vld [vmem:[%s3306_s20] sm:$0x1] }
 0x8d0   : > { %v2188_v52 = vmul.f32 0.5, %v2187_v55 }
 0x8d2   : > { %v2170_v57 = vpop.xlane.xlu0 %2169  ;;  %v2189_v58 = vsub.f32 1.5, %v2188_v52 }
 0x8d3   : > { %v2705_v60 = vpop.eup %2704  ;;  %v2183_v61 = vmul.f32 %v2180_v45, %v2170_v57 }
 0x8d4   : > { %v2190_v63 = vmul.f32 %v2703_v53, %v2189_v58  ;;  %v2198_v0 = vmul.f32 %v2705_v60, %v2182_v54  ;;  %v2352_v58 = vld [vmem:[%s3361_s6] sm:$0x1] }
 0x8d5   : > { %2706 = vrsqrt.f32 %v2183_v61  ;;  %vm2216_vm10 = vcmp.eq.f32.partialorder %v2183_v61, inf  ;;  %v2219_v20 = vand.u32 2147483648, %v2183_v61  ;;  %vm2218_vm11 = vcmp.eq.f32.partialorder %v2183_v61, 0.0 }
 0x8d6   : > { %v2191_v62 = vmul.f32 %v2190_v63, %v2181_v47  ;;  %v2199_v1 = vmul.f32 %v2705_v60, %v2198_v0 }
 0x8d8   : > { %v2193_v34 = vsel %vm2192_vm5, %v2181_v47, %v2191_v62  ;;  %v2200_v5 = vmul.f32 0.5, %v2199_v1 }
 0x8d9   : > { %v2196_v6 = vsel %vm2194_vm6, %v2195_v4, %v2193_v34 }
 0x8da   : > { %2237 = vxpose.xlu1.b32.cont [5/8] (short) (narrow) %v2196_v6, 8  ;;  %v2173_v7 = vpop.xlane.xlu2 %2172  ;;  %v2201_v8 = vsub.f32 1.5, %v2200_v5 }
 0x8db   : > { %v2707_v11 = vpop.eup %2706  ;;  %v2184_v12 = vmul.f32 %v2180_v45, %v2173_v7 }
 0x8dc   : > { %v2202_v13 = vmul.f32 %v2705_v60, %v2201_v8  ;;  %v2210_v29 = vmul.f32 %v2707_v11, %v2183_v61  ;;  %v2354_v60 = vld [vmem:[%s3362_s3] sm:$0x1]  ;;  %s2730_s3 = scalar_lea.hbm %s3360_s28, 2 }
 0x8dd   : > { %2708 = vrsqrt.f32 %v2184_v12  ;;  %vm2228_vm12 = vcmp.eq.f32.partialorder %v2184_v12, inf  ;;  %v2231_v28 = vand.u32 2147483648, %v2184_v12  ;;  %vm2230_vm13 = vcmp.eq.f32.partialorder %v2184_v12, 0.0  ;;  %p2732_p1 = scmp.lt.s32.totalorder %s2730_s3, %s2726_s23 }
 0x8de   : > { %v2203_v59 = vmul.f32 %v2202_v13, %v2182_v54  ;;  %v2211_v14 = vmul.f32 %v2707_v11, %v2210_v29 }
 0x8df   : > { %p2733_p2 = por %p2732_p1, %p2731_p0 }
 0x8e0   : > { %v2205_v49 = vsel %vm2204_vm7, %v2182_v54, %v2203_v59  ;;  %v2212_v44 = vmul.f32 0.5, %v2211_v14 }
 0x8e1   : > { %v2208_v51 = vsel %vm2206_vm8, %v2207_v48, %v2205_v49  ;;  %p2734_p3 = pnand %p2733_p2, %p2729_p13 }
 0x8e2   : > { %2238 = vxpose.xlu1.b32.cont [6/8] (short) (narrow) %v2208_v51, 8  ;;  %v2213_v15 = vsub.f32 1.5, %v2212_v44 }
 0x8e3   : > { %v2709_v18 = vpop.eup %2708 }
 0x8e4   : > { %v2214_v16 = vmul.f32 %v2707_v11, %v2213_v15  ;;  %v2222_v17 = vmul.f32 %v2709_v18, %v2184_v12 }
 0x8e6   : > { %v2215_v30 = vmul.f32 %v2214_v16, %v2183_v61  ;;  %v2223_v19 = vmul.f32 %v2709_v18, %v2222_v17 }
 0x8e8   : > { %v2217_v21 = vsel %vm2216_vm10, %v2183_v61, %v2215_v30  ;;  %v2224_v23 = vmul.f32 0.5, %v2223_v19 }
 0x8e9   : > { %v2220_v24 = vsel %vm2218_vm11, %v2219_v20, %v2217_v21 }
 0x8ea   : > { %2239 = vxpose.xlu1.b32.cont [7/8] (short) (narrow) %v2220_v24, 8  ;;  %v2225_v25 = vsub.f32 1.5, %v2224_v23 }
 0x8ec   : > { %v2226_v26 = vmul.f32 %v2709_v18, %v2225_v25 }
 0x8ee   : > { %v2227_v27 = vmul.f32 %v2226_v26, %v2184_v12 }
 0x8f0   : > { %v2229_v2 = vsel %vm2228_vm12, %v2184_v12, %v2227_v27 }
 0x8f1   : > { %v2232_v31 = vsel %vm2230_vm13, %v2231_v28, %v2229_v2 }
 0x8f2   : > { %2240 = vxpose.xlu1.b32.end [8/8] (short) (narrow) %v2232_v31, 8 }
 0x95e   : > { %v2249_v22 = vpop.trf.xlu1 }
 0x95f   : > { %v2265_v35 = vpack.c.bf16 %v2249_v22, %v2249_v22 }
 0x961   : > { %2502 = vmatmul.msk.bf16.vlgmr.msra.gmra.mxu0 %vm2281_vm4, %v2265_v35 }
 0x9de   : > { %v2300_v40 = vpop.f32.mrf.mxu0 }
 0x9df   : > { %v2301_v41 = vadd.f32 %v2300_v40, %v2270_v39 }
 0x9e1   : > { %vm2304_vm14 = vcmp.ge.f32.partialorder %v2301_v41, 0.0  ;;  %v2305_v42 = vmul.f32 0.01, %v2301_v41 }
 0x9e3   : > { %v2306_v45 = vsel %vm2304_vm14, %v2301_v41, %v2305_v42 }
 0x9e4   : > { %v2308_v47 = vmul.f32 %v2307_v43, %v2306_v45 }
 0x9e6   : > { %v2310_v50 = vadd.f32 %v2309_v46, %v2308_v47  ;;  %v2302_v53 = vpop.f32.mrf.mxu0 }
 0x9e8   : > { %v2311_v54 = vpack.c.bf16 %v2310_v50, %v2310_v50 }
 0x9ea   : > { %2511 = vmatmul.msk.bf16.vlgmr.msra.gmra.mxu3 %vm1056_vm9, %v2311_v54  ;;  %vm2356_vm9 = vcmask 253952  }
 0xa6d   : > { %v2345_v55 = vpop.f32.mrf.mxu3 }
 0xa6e   : > { %v2346_v52 = vadd.f32 %v2345_v55, %v2316_v56 }
 0xa70   : > { %vm2349_vm15 = vcmp.ge.f32.partialorder %v2346_v52, 0.0  ;;  %v2350_v57 = vmul.f32 0.01, %v2346_v52 }
 0xa72   : > { %v2351_v36 = vsel %vm2349_vm15, %v2346_v52, %v2350_v57 }
 0xa73   : > { %v2353_v61 = vmul.f32 %v2352_v58, %v2351_v36 }
 0xa75   : > { %v2347_v63 = vpop.f32.mrf.mxu3  ;;  %v2355_v0 = vadd.f32 %v2354_v60, %v2353_v61 }
 0xa77   : > { %2357 = vst.msk [vmem:[%s700_s26] sm:$0x1] %vm2356_vm9, %v2355_v0 }
 0xa78   : > { %2737 = shalt.err (!%p2734_p3)
}
 0xa79   : > { %2529 = dma.vmem_to_hbm [thread:$0]  (%p2938_p5), %s2370_s7, 16, %s2372_s8, %s2359_s5  }
 0xa7a PF: > { %s3364_s22 = sld [smem:[#allocation7_spill]] }
 0xa7b   : > { %s3365_s24 = sld [smem:[#allocation5_spill]] }
 0xa80   : > { %p2535_p4 = scmp.ge.s32.totalorder %s3364_s22, 2 }
 0xa81   : > { %s2383_s26 = sand.u32 1, %s3365_s24  }
 0xa82   : > { %p2532_p7 = pnand %p2535_p4, %p2942_p6  ;;  %s2384_s0 = scalar_lea.sflag [#allocation3], %s2383_s26 }
 0xa84   : > { %p2533_p8 = pneg %p2532_p7 }
 0xa86   : > { %2755 = dma.done.wait (%p2533_p8), %s2384_s0, 16  }
 0xa87   : > { %2757 = vsyncadd (%p2533_p8), %s2384_s0, 4294967280  ;;  %s3367_s25 = sld [smem:[#allocation8_spill]]  ;;  %s3370_s4 = smov %s2764_s30 }
 0xa88   : > { %s3368_s23 = sld [smem:[#allocation6_spill]] }
 0xa89   : > { %s3369_s24 = sld [smem:[#allocation9_spill]] }
 0xa8d   : > { %p33_p9 = scmp.ge.s32.totalorder %s3367_s25, 4  }
 0xa8e   : > { %s3371_s30 = smov %s3368_s23 }
 0xa8f   :  { %35 = sbr.rel (!%p33_p9) target bundleno = 16 (0x10), region = 147 }
 0xa94   :  { %2389 = vsyncpa [#allocation3], 1 }
 0xa95   :  { %2391 = vsyncpa [#allocation3 + $0x1], 1 }

</bundles_post_ra>
